<compile_context>
chip_gen: v7x
topology: tpu7x:2x2x1
jax: 0.10.0
libtpu: 0.0.40
codegen_flags: <defaults>
</compile_context>

<pallas_src>
import functools
import math

import jax
import jax.numpy as jnp
from jax import lax
from jax.experimental import pallas as pl
from jax.experimental.pallas import tpu as pltpu


# ----------------------------- in-kernel math ------------------------------

def _erf(z):
    # Abramowitz & Stegun 7.1.26 rational approximation (|err| < 1.5e-7),
    # lowered with exp / abs / select / EUP reciprocal only.
    a1, a2, a3, a4, a5 = (0.254829592, -0.284496736, 1.421413741,
                          -1.453152027, 1.061405429)
    pc = 0.3275911
    sgn = jnp.where(z >= 0.0, 1.0, -1.0)
    az = jnp.abs(z)
    t = pl.reciprocal(1.0 + pc * az, approx=True)
    poly = ((((a5 * t + a4) * t + a3) * t + a2) * t + a1) * t
    return sgn * (1.0 - poly * jnp.exp(-az * az))


def _gelu_exact(x):
    return 0.5 * x * (1.0 + _erf(x * (1.0 / math.sqrt(2.0))))


def _layernorm(z, gamma, beta, eps=1e-5):
    mu = jnp.mean(z, axis=-1, keepdims=True)
    var = jnp.mean((z - mu) ** 2, axis=-1, keepdims=True)
    return (z - mu) * lax.rsqrt(var + eps) * gamma + beta


# --------------------------------- kernel ----------------------------------

def _landi_block_kernel(num_heads, head_dim, lora_scaling,
                        x_tile_ref, x_full_ref, ctx_ref,
                        ln1_g_ref, ln1_b_ref,
                        wq_ref, wkv_ref,
                        la_ref, lg_ref, lbq_ref, lbkv_ref,
                        wproj_ref, bproj_ref,
                        ln2_g_ref, ln2_b_ref,
                        w1_ref, b1_ref, w2_ref, b2_ref,
                        o_ref,
                        k_scr, v_scr, attn_scr):
    f32 = jnp.float32
    bf16 = jnp.bfloat16
    hd = head_dim
    C = num_heads * head_dim
    scale = head_dim ** (-0.5)
    nt = pl.program_id(1)

    ln1_g = ln1_g_ref[...]
    ln1_b = ln1_b_ref[...]

    # ---- context gate (tiny, per batch), with LoRA alpha/r scaling folded ---
    # TODO(synk): LandiLinear source was not provided; modeled as base Linear
    # (no bias) + context-gated LoRA: y = x@W + (alpha/r)*((x@A)*(ctx@G))@B.
    gate = jnp.dot(ctx_ref[0].astype(bf16), lg_ref[...],
                   preferred_element_type=f32)                       # (1, r)
    gate_s = gate * lora_scaling

    # ---- first sequence tile of each batch: build full-sequence K/V once ---
    @pl.when(nt == 0)
    def _build_kv():
        xf = x_full_ref[0]                                           # (N, C)
        xnf = _layernorm(xf, ln1_g, ln1_b).astype(bf16)
        lo = jnp.dot(xnf, la_ref[...], preferred_element_type=f32)   # (N, r)
        lo_g = (lo * gate_s).astype(bf16)
        kv = (jnp.dot(xnf, wkv_ref[...], preferred_element_type=f32)
              + jnp.dot(lo_g, lbkv_ref[...], preferred_element_type=f32))
        kvb = kv.astype(bf16)                                        # (N, 2C)
        for h in range(num_heads):
            k_scr[h] = kvb[:, h * hd:(h + 1) * hd]
            v_scr[h] = kvb[:, C + h * hd:C + (h + 1) * hd]

    # ---- per-tile: norm1 + q (base + context-gated LoRA) -------------------
    xb = x_tile_ref[0]                                               # (TN, C)
    xn = _layernorm(xb, ln1_g, ln1_b)
    xn_b = xn.astype(bf16)
    lo_t = jnp.dot(xn_b, la_ref[...], preferred_element_type=f32)
    lo_gt = (lo_t * gate_s).astype(bf16)
    q = (jnp.dot(xn_b, wq_ref[...], preferred_element_type=f32)
         + jnp.dot(lo_gt, lbq_ref[...], preferred_element_type=f32))
    q = q * scale                                                    # (TN, C)

    # ---- multi-head attention; heads write into a lane-dense VMEM slab -----
    # (static loop; ViT-scale head counts unroll fine)
    for h in range(num_heads):
        q_h = q[:, h * hd:(h + 1) * hd].astype(bf16)                 # (TN, hd)
        k_h = k_scr[h]                                               # (N, hd)
        v_h = v_scr[h]
        s = lax.dot_general(q_h, k_h, (((1,), (1,)), ((), ())),
                            preferred_element_type=f32)              # (TN, N)
        s = s - jnp.max(s, axis=-1, keepdims=True)
        p = jnp.exp(s)
        p = p * pl.reciprocal(jnp.sum(p, axis=-1, keepdims=True), approx=True)
        o_h = jnp.dot(p.astype(bf16), v_h, preferred_element_type=f32)
        attn_scr[:, h * hd:(h + 1) * hd] = o_h.astype(bf16)

    # ---- output projection + residual ---------------------------------------
    y = (jnp.dot(attn_scr[...], wproj_ref[...], preferred_element_type=f32)
         + bproj_ref[...])
    x1 = xb + y

    # ---- norm2 + MLP (exact GELU) + residual --------------------------------
    xn2 = _layernorm(x1, ln2_g_ref[...], ln2_b_ref[...])
    hdn = (jnp.dot(xn2.astype(bf16), w1_ref[...], preferred_element_type=f32)
           + b1_ref[...])
    hdn = _gelu_exact(hdn)
    mo = (jnp.dot(hdn.astype(bf16), w2_ref[...], preferred_element_type=f32)
          + b2_ref[...])
    o_ref[0] = (x1 + mo).astype(o_ref.dtype)


# -------------------------------- wrapper -----------------------------------

def _choose_seq_tile(n, target=256):
    if n <= target:
        return n
    for t in range(target, 7, -1):
        if n % t == 0 and t % 8 == 0:
            return t
    return n


def _vmem_limit_bytes(N, TN, C, hidden, r, H, hd):
    pad = lambda d, m: ((d + m - 1) // m) * m
    lane = lambda d: pad(d, 128)
    sub = lambda d: pad(max(d, 1), 8)
    # bf16 weights (constant index_map -> effectively single-buffered)
    weights = 2 * (sub(C) * lane(C)                      # wq
                   + sub(C) * lane(2 * C)                # wkv
                   + 2 * sub(C) * lane(r)                # lora A, gate G
                   + sub(r) * lane(C)                    # lora Bq
                   + sub(r) * lane(2 * C)                # lora Bkv
                   + sub(C) * lane(C)                    # proj W
                   + sub(C) * lane(hidden)               # fc1 W
                   + sub(hidden) * lane(C))              # fc2 W
    small = 4 * (6 * sub(1) * lane(C) + sub(1) * lane(hidden))
    blocks = 2 * 4 * (sub(TN) * lane(C) + sub(N) * lane(C) + sub(1) * lane(C))
    outblk = 2 * 4 * sub(TN) * lane(C)
    scratch = 2 * (2 * H * sub(N) * lane(hd)) + 2 * sub(TN) * lane(C)
    acts = 4 * (sub(TN) * lane(hidden) + sub(TN) * lane(N)
                + 6 * sub(TN) * lane(C)
                + sub(N) * lane(2 * C) + 2 * sub(N) * lane(C))
    est = weights + small + blocks + outblk + scratch + acts
    return int(min(64 * 2 ** 20, max(32 * 2 ** 20, 2 * est)))


def landi_block(x, ctx, params, num_heads):
    B, N, C = x.shape
    assert ctx.shape == (B, C)
    assert C % num_heads == 0
    head_dim = C // num_heads
    r = params["lora_a"].shape[1]
    hidden = params["w1"].shape[1]
    lora_scaling = float(params["lora_alpha"]) / float(r)

    TN = _choose_seq_tile(N)
    assert N % TN == 0
    NT = N // TN

    bf16 = jnp.bfloat16
    wqkv = params["wqkv"]
    lora_b = params["lora_b"]
    wq = wqkv[:, 0 * C:1 * C].astype(bf16)
    wkv = wqkv[:, 1 * C:3 * C].astype(bf16)        # merged K|V weight slab
    lbq = lora_b[:, 0 * C:1 * C].astype(bf16)
    lbkv = lora_b[:, 1 * C:3 * C].astype(bf16)     # merged K|V LoRA-B slab

    ctx3 = ctx.reshape(B, 1, C)

    def rep(shape):
        return pl.BlockSpec(shape, lambda b, n, _z=(0,) * len(shape): _z)

    kernel = functools.partial(_landi_block_kernel, num_heads, head_dim,
                               lora_scaling)

    wbytes = 2 * (C * C + C * 2 * C + 2 * C * r + r * C + r * 2 * C
                  + C * C + 2 * C * hidden)
    flops = (2 * B * N * C * 3 * C + 2 * B * N * r * 4 * C
             + 4 * B * N * N * C + 2 * B * N * C * C + 4 * B * N * C * hidden)
    cost = pl.CostEstimate(
        flops=int(flops),
        transcendentals=int(B * (num_heads * N * N + 2 * N * hidden)),
        bytes_accessed=int(2 * B * N * C * 4 + B * C * 4 + wbytes
                           + 4 * (6 * C + hidden)))

    return pl.pallas_call(
        kernel,
        out_shape=jax.ShapeDtypeStruct((B, N, C), x.dtype),
        grid=(B, NT),
        in_specs=[
            pl.BlockSpec((1, TN, C), lambda b, n: (b, n, 0)),   # x (Q tile)
            pl.BlockSpec((1, N, C), lambda b, n: (b, 0, 0)),    # x (full, K/V)
            pl.BlockSpec((1, 1, C), lambda b, n: (b, 0, 0)),    # ctx
            rep((1, C)), rep((1, C)),                           # norm1 g/b
            rep((C, C)), rep((C, 2 * C)),                       # Wq, Wkv
            rep((C, r)), rep((C, r)),                           # lora A, gate G
            rep((r, C)), rep((r, 2 * C)),                       # lora Bq, Bkv
            rep((C, C)), rep((1, C)),                           # proj W, b
            rep((1, C)), rep((1, C)),                           # norm2 g/b
            rep((C, hidden)), rep((1, hidden)),                 # fc1 W, b
            rep((hidden, C)), rep((1, C)),                      # fc2 W, b
        ],
        out_specs=pl.BlockSpec((1, TN, C), lambda b, n: (b, n, 0)),
        scratch_shapes=[
            pltpu.VMEM((num_heads, N, head_dim), bf16),   # K, per head
            pltpu.VMEM((num_heads, N, head_dim), bf16),   # V, per head
            pltpu.VMEM((TN, C), bf16),                    # attention out slab
        ],
        compiler_params=pltpu.CompilerParams(
            dimension_semantics=("parallel", "arbitrary"),
            vmem_limit_bytes=_vmem_limit_bytes(N, TN, C, hidden, r,
                                               num_heads, head_dim)),
        cost_estimate=cost,
    )(x, x, ctx3,
      params["ln1_g"], params["ln1_b"],
      wq, wkv,
      params["lora_a"].astype(bf16), params["lora_g"].astype(bf16),
      lbq, lbkv,
      params["wproj"].astype(bf16), params["bproj"],
      params["ln2_g"], params["ln2_b"],
      params["w1"].astype(bf16), params["b1"],
      params["w2"].astype(bf16), params["b2"])


def init_params(key, dim, ctx_dim, mlp_ratio=4.0, r=32, lora_alpha=1):
    hidden = int(dim * mlp_ratio)
    ks = jax.random.split(key, 7)
    std = 0.02
    f32 = jnp.float32
    return {
        "ln1_g": jnp.ones((1, dim), f32),
        "ln1_b": jnp.zeros((1, dim), f32),
        "wqkv": jax.random.normal(ks[0], (dim, 3 * dim), f32) * std,
        "lora_a": jax.random.normal(ks[1], (dim, r), f32) * std,
        "lora_b": jax.random.normal(ks[2], (r, 3 * dim), f32) * std,
        "lora_g": jax.random.normal(ks[3], (ctx_dim, r), f32) * std,
        "wproj": jax.random.normal(ks[4], (dim, dim), f32) * std,
        "bproj": jnp.zeros((1, dim), f32),
        "ln2_g": jnp.ones((1, dim), f32),
        "ln2_b": jnp.zeros((1, dim), f32),
        "w1": jax.random.normal(ks[5], (dim, hidden), f32) * std,
        "b1": jnp.zeros((1, hidden), f32),
        "w2": jax.random.normal(ks[6], (hidden, dim), f32) * std,
        "b2": jnp.zeros((1, dim), f32),
        "lora_alpha": lora_alpha,
        "r": r,
    }


if __name__ == "__main__":
    key = jax.random.PRNGKey(0)
    B, N, C = 2, 8, 32        # batch, seq, dim (ctx_dim must equal dim)
    num_heads = 4             # head_dim = 8, mlp hidden = 128
    kx, kc, kp = jax.random.split(key, 3)
    x = jax.random.normal(kx, (B, N, C), jnp.float32)
    ctx = jax.random.normal(kc, (B, C), jnp.float32)
    params = init_params(kp, dim=C, ctx_dim=C)

    out = landi_block(x, ctx, params, num_heads)
    out = jax.block_until_ready(out)
    assert out.shape == (B, N, C) and out.dtype == jnp.float32
    print("KERNEL_OK")
</pallas_src>

<mosaic_0001>
module attributes {stable_mosaic.version = 11 : i64} {
  func.func @_landi_block_kernel(%arg0: i32, %arg1: i32, %arg2: memref<1x8x32xf32, #tpu.memory_space<vmem>>, %arg3: memref<1x8x32xf32, #tpu.memory_space<vmem>>, %arg4: memref<1x1x32xf32, #tpu.memory_space<vmem>>, %arg5: memref<1x32xf32, #tpu.memory_space<vmem>>, %arg6: memref<1x32xf32, #tpu.memory_space<vmem>>, %arg7: memref<32x32xbf16, #tpu.memory_space<vmem>>, %arg8: memref<32x64xbf16, #tpu.memory_space<vmem>>, %arg9: memref<32x32xbf16, #tpu.memory_space<vmem>>, %arg10: memref<32x32xbf16, #tpu.memory_space<vmem>>, %arg11: memref<32x32xbf16, #tpu.memory_space<vmem>>, %arg12: memref<32x64xbf16, #tpu.memory_space<vmem>>, %arg13: memref<32x32xbf16, #tpu.memory_space<vmem>>, %arg14: memref<1x32xf32, #tpu.memory_space<vmem>>, %arg15: memref<1x32xf32, #tpu.memory_space<vmem>>, %arg16: memref<1x32xf32, #tpu.memory_space<vmem>>, %arg17: memref<32x128xbf16, #tpu.memory_space<vmem>>, %arg18: memref<1x128xf32, #tpu.memory_space<vmem>>, %arg19: memref<128x32xbf16, #tpu.memory_space<vmem>>, %arg20: memref<1x32xf32, #tpu.memory_space<vmem>>, %arg21: memref<1x8x32xf32, #tpu.memory_space<vmem>>, %arg22: memref<4x8x8xbf16, #tpu.memory_space<vmem>>, %arg23: memref<4x8x8xbf16, #tpu.memory_space<vmem>>, %arg24: memref<8x32xbf16, #tpu.memory_space<vmem>>) attributes {dimension_semantics = [#tpu.dimension_semantics<parallel>, #tpu.dimension_semantics<arbitrary>], iteration_bounds = array<i64: 2, 1>, scalar_prefetch = 0 : i64, scratch_operands = 3 : i64, tpu.core_type = #tpu.core_type<tc>, window_params = [{transform_indices = @transform_0, window_bounds = array<i64: 1, 8, 32>}, {transform_indices = @transform_1, window_bounds = array<i64: 1, 8, 32>}, {transform_indices = @transform_2, window_bounds = array<i64: 1, 1, 32>}, {pipeline_mode = #tpu.pipeline_mode<synchronous>, transform_indices = @transform_3, window_bounds = array<i64: 1, 32>}, {pipeline_mode = #tpu.pipeline_mode<synchronous>, transform_indices = @transform_4, window_bounds = array<i64: 1, 32>}, {pipeline_mode = #tpu.pipeline_mode<synchronous>, transform_indices = @transform_5, window_bounds = array<i64: 32, 32>}, {pipeline_mode = #tpu.pipeline_mode<synchronous>, transform_indices = @transform_6, window_bounds = array<i64: 32, 64>}, {pipeline_mode = #tpu.pipeline_mode<synchronous>, transform_indices = @transform_7, window_bounds = array<i64: 32, 32>}, {pipeline_mode = #tpu.pipeline_mode<synchronous>, transform_indices = @transform_8, window_bounds = array<i64: 32, 32>}, {pipeline_mode = #tpu.pipeline_mode<synchronous>, transform_indices = @transform_9, window_bounds = array<i64: 32, 32>}, {pipeline_mode = #tpu.pipeline_mode<synchronous>, transform_indices = @transform_10, window_bounds = array<i64: 32, 64>}, {pipeline_mode = #tpu.pipeline_mode<synchronous>, transform_indices = @transform_11, window_bounds = array<i64: 32, 32>}, {pipeline_mode = #tpu.pipeline_mode<synchronous>, transform_indices = @transform_12, window_bounds = array<i64: 1, 32>}, {pipeline_mode = #tpu.pipeline_mode<synchronous>, transform_indices = @transform_13, window_bounds = array<i64: 1, 32>}, {pipeline_mode = #tpu.pipeline_mode<synchronous>, transform_indices = @transform_14, window_bounds = array<i64: 1, 32>}, {pipeline_mode = #tpu.pipeline_mode<synchronous>, transform_indices = @transform_15, window_bounds = array<i64: 32, 128>}, {pipeline_mode = #tpu.pipeline_mode<synchronous>, transform_indices = @transform_16, window_bounds = array<i64: 1, 128>}, {pipeline_mode = #tpu.pipeline_mode<synchronous>, transform_indices = @transform_17, window_bounds = array<i64: 128, 32>}, {pipeline_mode = #tpu.pipeline_mode<synchronous>, transform_indices = @transform_18, window_bounds = array<i64: 1, 32>}, {transform_indices = @transform_19, window_bounds = array<i64: 1, 8, 32>}]} {
    %c0 = arith.constant 0 : index
    %c0_0 = arith.constant 0 : index
    %0 = vector.load %arg5[%c0, %c0_0] : memref<1x32xf32, #tpu.memory_space<vmem>>, vector<1x32xf32>
    %c0_1 = arith.constant 0 : index
    %c0_2 = arith.constant 0 : index
    %1 = vector.load %arg6[%c0_1, %c0_2] : memref<1x32xf32, #tpu.memory_space<vmem>>, vector<1x32xf32>
    %c0_3 = arith.constant 0 : index
    %c0_4 = arith.constant 0 : index
    %c0_5 = arith.constant 0 : index
    %2 = vector.load %arg4[%c0_3, %c0_4, %c0_5] : memref<1x1x32xf32, #tpu.memory_space<vmem>>, vector<1x1x32xf32>
    %3 = vector.shape_cast %2 : vector<1x1x32xf32> to vector<1x32xf32>
    %4 = arith.truncf %3 : vector<1x32xf32> to vector<1x32xbf16>
    %c0_6 = arith.constant 0 : index
    %c0_7 = arith.constant 0 : index
    %5 = vector.load %arg10[%c0_6, %c0_7] : memref<32x32xbf16, #tpu.memory_space<vmem>>, vector<32x32xbf16>
    %cst = arith.constant dense<0.000000e+00> : vector<1x32xf32>
    %6 = tpu.matmul %4, %5, %cst {dimension_numbers = #tpu.dot_dimension_numbers<[1], [0], [0], [1], [0, 0, 1, 1], [], []>} : vector<1x32xbf16>, vector<32x32xbf16>, vector<1x32xf32> -> vector<1x32xf32>
    %cst_8 = arith.constant 3.125000e-02 : f32
    %7 = vector.broadcast %cst_8 : f32 to vector<1x32xf32>
    %8 = arith.mulf %6, %7 : vector<1x32xf32>
    %c0_i32 = arith.constant 0 : i32
    %9 = arith.cmpi eq, %arg1, %c0_i32 : i32
    %10 = arith.extui %9 : i1 to i32
    %c0_i32_9 = arith.constant 0 : i32
    %11 = arith.cmpi ne, %10, %c0_i32_9 : i32
    scf.if %11 {
      %c0_114 = arith.constant 0 : index
      %c0_115 = arith.constant 0 : index
      %c0_116 = arith.constant 0 : index
      %220 = vector.load %arg3[%c0_114, %c0_115, %c0_116] : memref<1x8x32xf32, #tpu.memory_space<vmem>>, vector<1x8x32xf32>
      %221 = vector.shape_cast %220 : vector<1x8x32xf32> to vector<8x32xf32>
      %cst_117 = arith.constant dense<0.000000e+00> : vector<8xf32>
      %222 = vector.multi_reduction <add>, %221, %cst_117 [1] : vector<8x32xf32> to vector<8xf32>
      %223 = vector.shape_cast %222 : vector<8xf32> to vector<8x1xf32>
      %cst_118 = arith.constant 3.200000e+01 : f32
      %224 = vector.broadcast %cst_118 : f32 to vector<8x1xf32>
      %225 = arith.divf %223, %224 : vector<8x1xf32>
      %226 = vector.broadcast %225 : vector<8x1xf32> to vector<8x32xf32>
      %227 = arith.subf %221, %226 : vector<8x32xf32>
      %228 = arith.mulf %227, %227 : vector<8x32xf32>
      %cst_119 = arith.constant dense<0.000000e+00> : vector<8xf32>
      %229 = vector.multi_reduction <add>, %228, %cst_119 [1] : vector<8x32xf32> to vector<8xf32>
      %230 = vector.shape_cast %229 : vector<8xf32> to vector<8x1xf32>
      %cst_120 = arith.constant 3.200000e+01 : f32
      %231 = vector.broadcast %cst_120 : f32 to vector<8x1xf32>
      %232 = arith.divf %230, %231 : vector<8x1xf32>
      %233 = vector.broadcast %225 : vector<8x1xf32> to vector<8x32xf32>
      %234 = arith.subf %221, %233 : vector<8x32xf32>
      %cst_121 = arith.constant 9.99999974E-6 : f32
      %235 = vector.broadcast %cst_121 : f32 to vector<8x1xf32>
      %236 = arith.addf %232, %235 : vector<8x1xf32>
      %237 = math.rsqrt %236 : vector<8x1xf32>
      %238 = vector.broadcast %237 : vector<8x1xf32> to vector<8x32xf32>
      %239 = arith.mulf %234, %238 : vector<8x32xf32>
      %240 = vector.broadcast %0 : vector<1x32xf32> to vector<8x32xf32>
      %241 = arith.mulf %239, %240 : vector<8x32xf32>
      %242 = vector.broadcast %1 : vector<1x32xf32> to vector<8x32xf32>
      %243 = arith.addf %241, %242 : vector<8x32xf32>
      %244 = arith.truncf %243 : vector<8x32xf32> to vector<8x32xbf16>
      %c0_122 = arith.constant 0 : index
      %c0_123 = arith.constant 0 : index
      %245 = vector.load %arg9[%c0_122, %c0_123] : memref<32x32xbf16, #tpu.memory_space<vmem>>, vector<32x32xbf16>
      %cst_124 = arith.constant dense<0.000000e+00> : vector<8x32xf32>
      %246 = tpu.matmul %244, %245, %cst_124 {dimension_numbers = #tpu.dot_dimension_numbers<[1], [0], [0], [1], [0, 0, 1, 1], [], []>} : vector<8x32xbf16>, vector<32x32xbf16>, vector<8x32xf32> -> vector<8x32xf32>
      %247 = vector.broadcast %8 : vector<1x32xf32> to vector<8x32xf32>
      %248 = arith.mulf %246, %247 : vector<8x32xf32>
      %249 = arith.truncf %248 : vector<8x32xf32> to vector<8x32xbf16>
      %c0_125 = arith.constant 0 : index
      %c0_126 = arith.constant 0 : index
      %250 = vector.load %arg8[%c0_125, %c0_126] : memref<32x64xbf16, #tpu.memory_space<vmem>>, vector<32x64xbf16>
      %cst_127 = arith.constant dense<0.000000e+00> : vector<8x64xf32>
      %251 = tpu.matmul %244, %250, %cst_127 {dimension_numbers = #tpu.dot_dimension_numbers<[1], [0], [0], [1], [0, 0, 1, 1], [], []>} : vector<8x32xbf16>, vector<32x64xbf16>, vector<8x64xf32> -> vector<8x64xf32>
      %c0_128 = arith.constant 0 : index
      %c0_129 = arith.constant 0 : index
      %252 = vector.load %arg12[%c0_128, %c0_129] : memref<32x64xbf16, #tpu.memory_space<vmem>>, vector<32x64xbf16>
      %cst_130 = arith.constant dense<0.000000e+00> : vector<8x64xf32>
      %253 = tpu.matmul %249, %252, %cst_130 {dimension_numbers = #tpu.dot_dimension_numbers<[1], [0], [0], [1], [0, 0, 1, 1], [], []>} : vector<8x32xbf16>, vector<32x64xbf16>, vector<8x64xf32> -> vector<8x64xf32>
      %254 = arith.addf %251, %253 : vector<8x64xf32>
      %255 = arith.truncf %254 : vector<8x64xf32> to vector<8x64xbf16>
      %256 = vector.extract_strided_slice %255 {offsets = [0, 0], sizes = [8, 8], strides = [1, 1]} : vector<8x64xbf16> to vector<8x8xbf16>
      %c0_131 = arith.constant 0 : index
      %c0_132 = arith.constant 0 : index
      %c0_133 = arith.constant 0 : index
      %257 = vector.load %arg22[%c0_131, %c0_132, %c0_133] : memref<4x8x8xbf16, #tpu.memory_space<vmem>>, vector<1x8x8xbf16>
      %258 = vector.shape_cast %257 : vector<1x8x8xbf16> to vector<8x8xbf16>
      %259 = vector.shape_cast %256 : vector<8x8xbf16> to vector<1x8x8xbf16>
      tpu.vector_store %arg22[%c0_131, %c0_132, %c0_133], %259 {strides = array<i32>} : memref<4x8x8xbf16, #tpu.memory_space<vmem>>, vector<1x8x8xbf16>,
      %260 = vector.extract_strided_slice %255 {offsets = [0, 32], sizes = [8, 8], strides = [1, 1]} : vector<8x64xbf16> to vector<8x8xbf16>
      %c0_134 = arith.constant 0 : index
      %c0_135 = arith.constant 0 : index
      %c0_136 = arith.constant 0 : index
      %261 = vector.load %arg23[%c0_134, %c0_135, %c0_136] : memref<4x8x8xbf16, #tpu.memory_space<vmem>>, vector<1x8x8xbf16>
      %262 = vector.shape_cast %261 : vector<1x8x8xbf16> to vector<8x8xbf16>
      %263 = vector.shape_cast %260 : vector<8x8xbf16> to vector<1x8x8xbf16>
      tpu.vector_store %arg23[%c0_134, %c0_135, %c0_136], %263 {strides = array<i32>} : memref<4x8x8xbf16, #tpu.memory_space<vmem>>, vector<1x8x8xbf16>,
      %264 = vector.extract_strided_slice %255 {offsets = [0, 8], sizes = [8, 8], strides = [1, 1]} : vector<8x64xbf16> to vector<8x8xbf16>
      %c1_137 = arith.constant 1 : index
      %c0_138 = arith.constant 0 : index
      %c0_139 = arith.constant 0 : index
      %265 = vector.load %arg22[%c1_137, %c0_138, %c0_139] : memref<4x8x8xbf16, #tpu.memory_space<vmem>>, vector<1x8x8xbf16>
      %266 = vector.shape_cast %265 : vector<1x8x8xbf16> to vector<8x8xbf16>
      %267 = vector.shape_cast %264 : vector<8x8xbf16> to vector<1x8x8xbf16>
      tpu.vector_store %arg22[%c1_137, %c0_138, %c0_139], %267 {strides = array<i32>} : memref<4x8x8xbf16, #tpu.memory_space<vmem>>, vector<1x8x8xbf16>,
      %268 = vector.extract_strided_slice %255 {offsets = [0, 40], sizes = [8, 8], strides = [1, 1]} : vector<8x64xbf16> to vector<8x8xbf16>
      %c1_140 = arith.constant 1 : index
      %c0_141 = arith.constant 0 : index
      %c0_142 = arith.constant 0 : index
      %269 = vector.load %arg23[%c1_140, %c0_141, %c0_142] : memref<4x8x8xbf16, #tpu.memory_space<vmem>>, vector<1x8x8xbf16>
      %270 = vector.shape_cast %269 : vector<1x8x8xbf16> to vector<8x8xbf16>
      %271 = vector.shape_cast %268 : vector<8x8xbf16> to vector<1x8x8xbf16>
      tpu.vector_store %arg23[%c1_140, %c0_141, %c0_142], %271 {strides = array<i32>} : memref<4x8x8xbf16, #tpu.memory_space<vmem>>, vector<1x8x8xbf16>,
      %272 = vector.extract_strided_slice %255 {offsets = [0, 16], sizes = [8, 8], strides = [1, 1]} : vector<8x64xbf16> to vector<8x8xbf16>
      %c2_143 = arith.constant 2 : index
      %c0_144 = arith.constant 0 : index
      %c0_145 = arith.constant 0 : index
      %273 = vector.load %arg22[%c2_143, %c0_144, %c0_145] : memref<4x8x8xbf16, #tpu.memory_space<vmem>>, vector<1x8x8xbf16>
      %274 = vector.shape_cast %273 : vector<1x8x8xbf16> to vector<8x8xbf16>
      %275 = vector.shape_cast %272 : vector<8x8xbf16> to vector<1x8x8xbf16>
      tpu.vector_store %arg22[%c2_143, %c0_144, %c0_145], %275 {strides = array<i32>} : memref<4x8x8xbf16, #tpu.memory_space<vmem>>, vector<1x8x8xbf16>,
      %276 = vector.extract_strided_slice %255 {offsets = [0, 48], sizes = [8, 8], strides = [1, 1]} : vector<8x64xbf16> to vector<8x8xbf16>
      %c2_146 = arith.constant 2 : index
      %c0_147 = arith.constant 0 : index
      %c0_148 = arith.constant 0 : index
      %277 = vector.load %arg23[%c2_146, %c0_147, %c0_148] : memref<4x8x8xbf16, #tpu.memory_space<vmem>>, vector<1x8x8xbf16>
      %278 = vector.shape_cast %277 : vector<1x8x8xbf16> to vector<8x8xbf16>
      %279 = vector.shape_cast %276 : vector<8x8xbf16> to vector<1x8x8xbf16>
      tpu.vector_store %arg23[%c2_146, %c0_147, %c0_148], %279 {strides = array<i32>} : memref<4x8x8xbf16, #tpu.memory_space<vmem>>, vector<1x8x8xbf16>,
      %280 = vector.extract_strided_slice %255 {offsets = [0, 24], sizes = [8, 8], strides = [1, 1]} : vector<8x64xbf16> to vector<8x8xbf16>
      %c3_149 = arith.constant 3 : index
      %c0_150 = arith.constant 0 : index
      %c0_151 = arith.constant 0 : index
      %281 = vector.load %arg22[%c3_149, %c0_150, %c0_151] : memref<4x8x8xbf16, #tpu.memory_space<vmem>>, vector<1x8x8xbf16>
      %282 = vector.shape_cast %281 : vector<1x8x8xbf16> to vector<8x8xbf16>
      %283 = vector.shape_cast %280 : vector<8x8xbf16> to vector<1x8x8xbf16>
      tpu.vector_store %arg22[%c3_149, %c0_150, %c0_151], %283 {strides = array<i32>} : memref<4x8x8xbf16, #tpu.memory_space<vmem>>, vector<1x8x8xbf16>,
      %284 = vector.extract_strided_slice %255 {offsets = [0, 56], sizes = [8, 8], strides = [1, 1]} : vector<8x64xbf16> to vector<8x8xbf16>
      %c3_152 = arith.constant 3 : index
      %c0_153 = arith.constant 0 : index
      %c0_154 = arith.constant 0 : index
      %285 = vector.load %arg23[%c3_152, %c0_153, %c0_154] : memref<4x8x8xbf16, #tpu.memory_space<vmem>>, vector<1x8x8xbf16>
      %286 = vector.shape_cast %285 : vector<1x8x8xbf16> to vector<8x8xbf16>
      %287 = vector.shape_cast %284 : vector<8x8xbf16> to vector<1x8x8xbf16>
      tpu.vector_store %arg23[%c3_152, %c0_153, %c0_154], %287 {strides = array<i32>} : memref<4x8x8xbf16, #tpu.memory_space<vmem>>, vector<1x8x8xbf16>,
    } else {
    }
    %c0_10 = arith.constant 0 : index
    %c0_11 = arith.constant 0 : index
    %c0_12 = arith.constant 0 : index
    %12 = vector.load %arg2[%c0_10, %c0_11, %c0_12] : memref<1x8x32xf32, #tpu.memory_space<vmem>>, vector<1x8x32xf32>
    %13 = vector.shape_cast %12 : vector<1x8x32xf32> to vector<8x32xf32>
    %cst_13 = arith.constant dense<0.000000e+00> : vector<8xf32>
    %14 = vector.multi_reduction <add>, %13, %cst_13 [1] : vector<8x32xf32> to vector<8xf32>
    %15 = vector.shape_cast %14 : vector<8xf32> to vector<8x1xf32>
    %cst_14 = arith.constant 3.200000e+01 : f32
    %16 = vector.broadcast %cst_14 : f32 to vector<8x1xf32>
    %17 = arith.divf %15, %16 : vector<8x1xf32>
    %18 = vector.broadcast %17 : vector<8x1xf32> to vector<8x32xf32>
    %19 = arith.subf %13, %18 : vector<8x32xf32>
    %20 = arith.mulf %19, %19 : vector<8x32xf32>
    %cst_15 = arith.constant dense<0.000000e+00> : vector<8xf32>
    %21 = vector.multi_reduction <add>, %20, %cst_15 [1] : vector<8x32xf32> to vector<8xf32>
    %22 = vector.shape_cast %21 : vector<8xf32> to vector<8x1xf32>
    %cst_16 = arith.constant 3.200000e+01 : f32
    %23 = vector.broadcast %cst_16 : f32 to vector<8x1xf32>
    %24 = arith.divf %22, %23 : vector<8x1xf32>
    %25 = vector.broadcast %17 : vector<8x1xf32> to vector<8x32xf32>
    %26 = arith.subf %13, %25 : vector<8x32xf32>
    %cst_17 = arith.constant 9.99999974E-6 : f32
    %27 = vector.broadcast %cst_17 : f32 to vector<8x1xf32>
    %28 = arith.addf %24, %27 : vector<8x1xf32>
    %29 = math.rsqrt %28 : vector<8x1xf32>
    %30 = vector.broadcast %29 : vector<8x1xf32> to vector<8x32xf32>
    %31 = arith.mulf %26, %30 : vector<8x32xf32>
    %32 = vector.broadcast %0 : vector<1x32xf32> to vector<8x32xf32>
    %33 = arith.mulf %31, %32 : vector<8x32xf32>
    %34 = vector.broadcast %1 : vector<1x32xf32> to vector<8x32xf32>
    %35 = arith.addf %33, %34 : vector<8x32xf32>
    %36 = arith.truncf %35 : vector<8x32xf32> to vector<8x32xbf16>
    %c0_18 = arith.constant 0 : index
    %c0_19 = arith.constant 0 : index
    %37 = vector.load %arg9[%c0_18, %c0_19] : memref<32x32xbf16, #tpu.memory_space<vmem>>, vector<32x32xbf16>
    %cst_20 = arith.constant dense<0.000000e+00> : vector<8x32xf32>
    %38 = tpu.matmul %36, %37, %cst_20 {dimension_numbers = #tpu.dot_dimension_numbers<[1], [0], [0], [1], [0, 0, 1, 1], [], []>} : vector<8x32xbf16>, vector<32x32xbf16>, vector<8x32xf32> -> vector<8x32xf32>
    %39 = vector.broadcast %8 : vector<1x32xf32> to vector<8x32xf32>
    %40 = arith.mulf %38, %39 : vector<8x32xf32>
    %41 = arith.truncf %40 : vector<8x32xf32> to vector<8x32xbf16>
    %c0_21 = arith.constant 0 : index
    %c0_22 = arith.constant 0 : index
    %42 = vector.load %arg7[%c0_21, %c0_22] : memref<32x32xbf16, #tpu.memory_space<vmem>>, vector<32x32xbf16>
    %cst_23 = arith.constant dense<0.000000e+00> : vector<8x32xf32>
    %43 = tpu.matmul %36, %42, %cst_23 {dimension_numbers = #tpu.dot_dimension_numbers<[1], [0], [0], [1], [0, 0, 1, 1], [], []>} : vector<8x32xbf16>, vector<32x32xbf16>, vector<8x32xf32> -> vector<8x32xf32>
    %c0_24 = arith.constant 0 : index
    %c0_25 = arith.constant 0 : index
    %44 = vector.load %arg11[%c0_24, %c0_25] : memref<32x32xbf16, #tpu.memory_space<vmem>>, vector<32x32xbf16>
    %cst_26 = arith.constant dense<0.000000e+00> : vector<8x32xf32>
    %45 = tpu.matmul %41, %44, %cst_26 {dimension_numbers = #tpu.dot_dimension_numbers<[1], [0], [0], [1], [0, 0, 1, 1], [], []>} : vector<8x32xbf16>, vector<32x32xbf16>, vector<8x32xf32> -> vector<8x32xf32>
    %46 = arith.addf %43, %45 : vector<8x32xf32>
    %cst_27 = arith.constant 0.353553385 : f32
    %47 = vector.broadcast %cst_27 : f32 to vector<8x32xf32>
    %48 = arith.mulf %46, %47 : vector<8x32xf32>
    %49 = vector.extract_strided_slice %48 {offsets = [0, 0], sizes = [8, 8], strides = [1, 1]} : vector<8x32xf32> to vector<8x8xf32>
    %50 = arith.truncf %49 : vector<8x8xf32> to vector<8x8xbf16>
    %c0_28 = arith.constant 0 : index
    %c0_29 = arith.constant 0 : index
    %c0_30 = arith.constant 0 : index
    %51 = vector.load %arg22[%c0_28, %c0_29, %c0_30] : memref<4x8x8xbf16, #tpu.memory_space<vmem>>, vector<1x8x8xbf16>
    %52 = vector.shape_cast %51 : vector<1x8x8xbf16> to vector<8x8xbf16>
    %c0_31 = arith.constant 0 : index
    %c0_32 = arith.constant 0 : index
    %c0_33 = arith.constant 0 : index
    %53 = vector.load %arg23[%c0_31, %c0_32, %c0_33] : memref<4x8x8xbf16, #tpu.memory_space<vmem>>, vector<1x8x8xbf16>
    %54 = vector.shape_cast %53 : vector<1x8x8xbf16> to vector<8x8xbf16>
    %cst_34 = arith.constant dense<0.000000e+00> : vector<8x8xf32>
    %55 = tpu.matmul %50, %52, %cst_34 {dimension_numbers = #tpu.dot_dimension_numbers<[1], [1], [0], [0], [0, 0, 1, 0], [], []>} : vector<8x8xbf16>, vector<8x8xbf16>, vector<8x8xf32> -> vector<8x8xf32>
    %cst_35 = arith.constant dense<0xFF800000> : vector<8xf32>
    %56 = vector.multi_reduction <maximumf>, %55, %cst_35 [1] : vector<8x8xf32> to vector<8xf32>
    %57 = vector.shape_cast %56 : vector<8xf32> to vector<8x1xf32>
    %58 = vector.broadcast %57 : vector<8x1xf32> to vector<8x8xf32>
    %59 = arith.subf %55, %58 : vector<8x8xf32>
    %60 = math.exp %59 : vector<8x8xf32>
    %cst_36 = arith.constant dense<0.000000e+00> : vector<8xf32>
    %61 = vector.multi_reduction <add>, %60, %cst_36 [1] : vector<8x8xf32> to vector<8xf32>
    %62 = vector.shape_cast %61 : vector<8xf32> to vector<8x1xf32>
    %63 = tpu.reciprocal %62 {approx = true} : vector<8x1xf32> -> vector<8x1xf32>
    %64 = vector.broadcast %63 : vector<8x1xf32> to vector<8x8xf32>
    %65 = arith.mulf %60, %64 : vector<8x8xf32>
    %66 = arith.truncf %65 : vector<8x8xf32> to vector<8x8xbf16>
    %cst_37 = arith.constant dense<0.000000e+00> : vector<8x8xf32>
    %67 = tpu.matmul %66, %54, %cst_37 {dimension_numbers = #tpu.dot_dimension_numbers<[1], [0], [0], [1], [0, 0, 1, 1], [], []>} : vector<8x8xbf16>, vector<8x8xbf16>, vector<8x8xf32> -> vector<8x8xf32>
    %68 = arith.truncf %67 : vector<8x8xf32> to vector<8x8xbf16>
    %c0_38 = arith.constant 0 : index
    %c0_39 = arith.constant 0 : index
    %69 = vector.load %arg24[%c0_38, %c0_39] : memref<8x32xbf16, #tpu.memory_space<vmem>>, vector<8x8xbf16>
    tpu.vector_store %arg24[%c0_38, %c0_39], %68 {strides = array<i32>} : memref<8x32xbf16, #tpu.memory_space<vmem>>, vector<8x8xbf16>,
    %70 = vector.extract_strided_slice %48 {offsets = [0, 8], sizes = [8, 8], strides = [1, 1]} : vector<8x32xf32> to vector<8x8xf32>
    %71 = arith.truncf %70 : vector<8x8xf32> to vector<8x8xbf16>
    %c1 = arith.constant 1 : index
    %c0_40 = arith.constant 0 : index
    %c0_41 = arith.constant 0 : index
    %72 = vector.load %arg22[%c1, %c0_40, %c0_41] : memref<4x8x8xbf16, #tpu.memory_space<vmem>>, vector<1x8x8xbf16>
    %73 = vector.shape_cast %72 : vector<1x8x8xbf16> to vector<8x8xbf16>
    %c1_42 = arith.constant 1 : index
    %c0_43 = arith.constant 0 : index
    %c0_44 = arith.constant 0 : index
    %74 = vector.load %arg23[%c1_42, %c0_43, %c0_44] : memref<4x8x8xbf16, #tpu.memory_space<vmem>>, vector<1x8x8xbf16>
    %75 = vector.shape_cast %74 : vector<1x8x8xbf16> to vector<8x8xbf16>
    %cst_45 = arith.constant dense<0.000000e+00> : vector<8x8xf32>
    %76 = tpu.matmul %71, %73, %cst_45 {dimension_numbers = #tpu.dot_dimension_numbers<[1], [1], [0], [0], [0, 0, 1, 0], [], []>} : vector<8x8xbf16>, vector<8x8xbf16>, vector<8x8xf32> -> vector<8x8xf32>
    %cst_46 = arith.constant dense<0xFF800000> : vector<8xf32>
    %77 = vector.multi_reduction <maximumf>, %76, %cst_46 [1] : vector<8x8xf32> to vector<8xf32>
    %78 = vector.shape_cast %77 : vector<8xf32> to vector<8x1xf32>
    %79 = vector.broadcast %78 : vector<8x1xf32> to vector<8x8xf32>
    %80 = arith.subf %76, %79 : vector<8x8xf32>
    %81 = math.exp %80 : vector<8x8xf32>
    %cst_47 = arith.constant dense<0.000000e+00> : vector<8xf32>
    %82 = vector.multi_reduction <add>, %81, %cst_47 [1] : vector<8x8xf32> to vector<8xf32>
    %83 = vector.shape_cast %82 : vector<8xf32> to vector<8x1xf32>
    %84 = tpu.reciprocal %83 {approx = true} : vector<8x1xf32> -> vector<8x1xf32>
    %85 = vector.broadcast %84 : vector<8x1xf32> to vector<8x8xf32>
    %86 = arith.mulf %81, %85 : vector<8x8xf32>
    %87 = arith.truncf %86 : vector<8x8xf32> to vector<8x8xbf16>
    %cst_48 = arith.constant dense<0.000000e+00> : vector<8x8xf32>
    %88 = tpu.matmul %87, %75, %cst_48 {dimension_numbers = #tpu.dot_dimension_numbers<[1], [0], [0], [1], [0, 0, 1, 1], [], []>} : vector<8x8xbf16>, vector<8x8xbf16>, vector<8x8xf32> -> vector<8x8xf32>
    %89 = arith.truncf %88 : vector<8x8xf32> to vector<8x8xbf16>
    %c0_49 = arith.constant 0 : index
    %c8 = arith.constant 8 : index
    %90 = vector.load %arg24[%c0_49, %c8] : memref<8x32xbf16, #tpu.memory_space<vmem>>, vector<8x8xbf16>
    tpu.vector_store %arg24[%c0_49, %c8], %89 {strides = array<i32>} : memref<8x32xbf16, #tpu.memory_space<vmem>>, vector<8x8xbf16>,
    %91 = vector.extract_strided_slice %48 {offsets = [0, 16], sizes = [8, 8], strides = [1, 1]} : vector<8x32xf32> to vector<8x8xf32>
    %92 = arith.truncf %91 : vector<8x8xf32> to vector<8x8xbf16>
    %c2 = arith.constant 2 : index
    %c0_50 = arith.constant 0 : index
    %c0_51 = arith.constant 0 : index
    %93 = vector.load %arg22[%c2, %c0_50, %c0_51] : memref<4x8x8xbf16, #tpu.memory_space<vmem>>, vector<1x8x8xbf16>
    %94 = vector.shape_cast %93 : vector<1x8x8xbf16> to vector<8x8xbf16>
    %c2_52 = arith.constant 2 : index
    %c0_53 = arith.constant 0 : index
    %c0_54 = arith.constant 0 : index
    %95 = vector.load %arg23[%c2_52, %c0_53, %c0_54] : memref<4x8x8xbf16, #tpu.memory_space<vmem>>, vector<1x8x8xbf16>
    %96 = vector.shape_cast %95 : vector<1x8x8xbf16> to vector<8x8xbf16>
    %cst_55 = arith.constant dense<0.000000e+00> : vector<8x8xf32>
    %97 = tpu.matmul %92, %94, %cst_55 {dimension_numbers = #tpu.dot_dimension_numbers<[1], [1], [0], [0], [0, 0, 1, 0], [], []>} : vector<8x8xbf16>, vector<8x8xbf16>, vector<8x8xf32> -> vector<8x8xf32>
    %cst_56 = arith.constant dense<0xFF800000> : vector<8xf32>
    %98 = vector.multi_reduction <maximumf>, %97, %cst_56 [1] : vector<8x8xf32> to vector<8xf32>
    %99 = vector.shape_cast %98 : vector<8xf32> to vector<8x1xf32>
    %100 = vector.broadcast %99 : vector<8x1xf32> to vector<8x8xf32>
    %101 = arith.subf %97, %100 : vector<8x8xf32>
    %102 = math.exp %101 : vector<8x8xf32>
    %cst_57 = arith.constant dense<0.000000e+00> : vector<8xf32>
    %103 = vector.multi_reduction <add>, %102, %cst_57 [1] : vector<8x8xf32> to vector<8xf32>
    %104 = vector.shape_cast %103 : vector<8xf32> to vector<8x1xf32>
    %105 = tpu.reciprocal %104 {approx = true} : vector<8x1xf32> -> vector<8x1xf32>
    %106 = vector.broadcast %105 : vector<8x1xf32> to vector<8x8xf32>
    %107 = arith.mulf %102, %106 : vector<8x8xf32>
    %108 = arith.truncf %107 : vector<8x8xf32> to vector<8x8xbf16>
    %cst_58 = arith.constant dense<0.000000e+00> : vector<8x8xf32>
    %109 = tpu.matmul %108, %96, %cst_58 {dimension_numbers = #tpu.dot_dimension_numbers<[1], [0], [0], [1], [0, 0, 1, 1], [], []>} : vector<8x8xbf16>, vector<8x8xbf16>, vector<8x8xf32> -> vector<8x8xf32>
    %110 = arith.truncf %109 : vector<8x8xf32> to vector<8x8xbf16>
    %c0_59 = arith.constant 0 : index
    %c16 = arith.constant 16 : index
    %111 = vector.load %arg24[%c0_59, %c16] : memref<8x32xbf16, #tpu.memory_space<vmem>>, vector<8x8xbf16>
    tpu.vector_store %arg24[%c0_59, %c16], %110 {strides = array<i32>} : memref<8x32xbf16, #tpu.memory_space<vmem>>, vector<8x8xbf16>,
    %112 = vector.extract_strided_slice %48 {offsets = [0, 24], sizes = [8, 8], strides = [1, 1]} : vector<8x32xf32> to vector<8x8xf32>
    %113 = arith.truncf %112 : vector<8x8xf32> to vector<8x8xbf16>
    %c3 = arith.constant 3 : index
    %c0_60 = arith.constant 0 : index
    %c0_61 = arith.constant 0 : index
    %114 = vector.load %arg22[%c3, %c0_60, %c0_61] : memref<4x8x8xbf16, #tpu.memory_space<vmem>>, vector<1x8x8xbf16>
    %115 = vector.shape_cast %114 : vector<1x8x8xbf16> to vector<8x8xbf16>
    %c3_62 = arith.constant 3 : index
    %c0_63 = arith.constant 0 : index
    %c0_64 = arith.constant 0 : index
    %116 = vector.load %arg23[%c3_62, %c0_63, %c0_64] : memref<4x8x8xbf16, #tpu.memory_space<vmem>>, vector<1x8x8xbf16>
    %117 = vector.shape_cast %116 : vector<1x8x8xbf16> to vector<8x8xbf16>
    %cst_65 = arith.constant dense<0.000000e+00> : vector<8x8xf32>
    %118 = tpu.matmul %113, %115, %cst_65 {dimension_numbers = #tpu.dot_dimension_numbers<[1], [1], [0], [0], [0, 0, 1, 0], [], []>} : vector<8x8xbf16>, vector<8x8xbf16>, vector<8x8xf32> -> vector<8x8xf32>
    %cst_66 = arith.constant dense<0xFF800000> : vector<8xf32>
    %119 = vector.multi_reduction <maximumf>, %118, %cst_66 [1] : vector<8x8xf32> to vector<8xf32>
    %120 = vector.shape_cast %119 : vector<8xf32> to vector<8x1xf32>
    %121 = vector.broadcast %120 : vector<8x1xf32> to vector<8x8xf32>
    %122 = arith.subf %118, %121 : vector<8x8xf32>
    %123 = math.exp %122 : vector<8x8xf32>
    %cst_67 = arith.constant dense<0.000000e+00> : vector<8xf32>
    %124 = vector.multi_reduction <add>, %123, %cst_67 [1] : vector<8x8xf32> to vector<8xf32>
    %125 = vector.shape_cast %124 : vector<8xf32> to vector<8x1xf32>
    %126 = tpu.reciprocal %125 {approx = true} : vector<8x1xf32> -> vector<8x1xf32>
    %127 = vector.broadcast %126 : vector<8x1xf32> to vector<8x8xf32>
    %128 = arith.mulf %123, %127 : vector<8x8xf32>
    %129 = arith.truncf %128 : vector<8x8xf32> to vector<8x8xbf16>
    %cst_68 = arith.constant dense<0.000000e+00> : vector<8x8xf32>
    %130 = tpu.matmul %129, %117, %cst_68 {dimension_numbers = #tpu.dot_dimension_numbers<[1], [0], [0], [1], [0, 0, 1, 1], [], []>} : vector<8x8xbf16>, vector<8x8xbf16>, vector<8x8xf32> -> vector<8x8xf32>
    %131 = arith.truncf %130 : vector<8x8xf32> to vector<8x8xbf16>
    %c0_69 = arith.constant 0 : index
    %c24 = arith.constant 24 : index
    %132 = vector.load %arg24[%c0_69, %c24] : memref<8x32xbf16, #tpu.memory_space<vmem>>, vector<8x8xbf16>
    tpu.vector_store %arg24[%c0_69, %c24], %131 {strides = array<i32>} : memref<8x32xbf16, #tpu.memory_space<vmem>>, vector<8x8xbf16>,
    %c0_70 = arith.constant 0 : index
    %c0_71 = arith.constant 0 : index
    %133 = vector.load %arg24[%c0_70, %c0_71] : memref<8x32xbf16, #tpu.memory_space<vmem>>, vector<8x32xbf16>
    %c0_72 = arith.constant 0 : index
    %c0_73 = arith.constant 0 : index
    %134 = vector.load %arg13[%c0_72, %c0_73] : memref<32x32xbf16, #tpu.memory_space<vmem>>, vector<32x32xbf16>
    %cst_74 = arith.constant dense<0.000000e+00> : vector<8x32xf32>
    %135 = tpu.matmul %133, %134, %cst_74 {dimension_numbers = #tpu.dot_dimension_numbers<[1], [0], [0], [1], [0, 0, 1, 1], [], []>} : vector<8x32xbf16>, vector<32x32xbf16>, vector<8x32xf32> -> vector<8x32xf32>
    %c0_75 = arith.constant 0 : index
    %c0_76 = arith.constant 0 : index
    %136 = vector.load %arg14[%c0_75, %c0_76] : memref<1x32xf32, #tpu.memory_space<vmem>>, vector<1x32xf32>
    %137 = vector.broadcast %136 : vector<1x32xf32> to vector<8x32xf32>
    %138 = arith.addf %135, %137 : vector<8x32xf32>
    %139 = arith.addf %13, %138 : vector<8x32xf32>
    %c0_77 = arith.constant 0 : index
    %c0_78 = arith.constant 0 : index
    %140 = vector.load %arg15[%c0_77, %c0_78] : memref<1x32xf32, #tpu.memory_space<vmem>>, vector<1x32xf32>
    %c0_79 = arith.constant 0 : index
    %c0_80 = arith.constant 0 : index
    %141 = vector.load %arg16[%c0_79, %c0_80] : memref<1x32xf32, #tpu.memory_space<vmem>>, vector<1x32xf32>
    %cst_81 = arith.constant dense<0.000000e+00> : vector<8xf32>
    %142 = vector.multi_reduction <add>, %139, %cst_81 [1] : vector<8x32xf32> to vector<8xf32>
    %143 = vector.shape_cast %142 : vector<8xf32> to vector<8x1xf32>
    %cst_82 = arith.constant 3.200000e+01 : f32
    %144 = vector.broadcast %cst_82 : f32 to vector<8x1xf32>
    %145 = arith.divf %143, %144 : vector<8x1xf32>
    %146 = vector.broadcast %145 : vector<8x1xf32> to vector<8x32xf32>
    %147 = arith.subf %139, %146 : vector<8x32xf32>
    %148 = arith.mulf %147, %147 : vector<8x32xf32>
    %cst_83 = arith.constant dense<0.000000e+00> : vector<8xf32>
    %149 = vector.multi_reduction <add>, %148, %cst_83 [1] : vector<8x32xf32> to vector<8xf32>
    %150 = vector.shape_cast %149 : vector<8xf32> to vector<8x1xf32>
    %cst_84 = arith.constant 3.200000e+01 : f32
    %151 = vector.broadcast %cst_84 : f32 to vector<8x1xf32>
    %152 = arith.divf %150, %151 : vector<8x1xf32>
    %153 = vector.broadcast %145 : vector<8x1xf32> to vector<8x32xf32>
    %154 = arith.subf %139, %153 : vector<8x32xf32>
    %cst_85 = arith.constant 9.99999974E-6 : f32
    %155 = vector.broadcast %cst_85 : f32 to vector<8x1xf32>
    %156 = arith.addf %152, %155 : vector<8x1xf32>
    %157 = math.rsqrt %156 : vector<8x1xf32>
    %158 = vector.broadcast %157 : vector<8x1xf32> to vector<8x32xf32>
    %159 = arith.mulf %154, %158 : vector<8x32xf32>
    %160 = vector.broadcast %140 : vector<1x32xf32> to vector<8x32xf32>
    %161 = arith.mulf %159, %160 : vector<8x32xf32>
    %162 = vector.broadcast %141 : vector<1x32xf32> to vector<8x32xf32>
    %163 = arith.addf %161, %162 : vector<8x32xf32>
    %164 = arith.truncf %163 : vector<8x32xf32> to vector<8x32xbf16>
    %c0_86 = arith.constant 0 : index
    %c0_87 = arith.constant 0 : index
    %165 = vector.load %arg17[%c0_86, %c0_87] : memref<32x128xbf16, #tpu.memory_space<vmem>>, vector<32x128xbf16>
    %cst_88 = arith.constant dense<0.000000e+00> : vector<8x128xf32>
    %166 = tpu.matmul %164, %165, %cst_88 {dimension_numbers = #tpu.dot_dimension_numbers<[1], [0], [0], [1], [0, 0, 1, 1], [], []>} : vector<8x32xbf16>, vector<32x128xbf16>, vector<8x128xf32> -> vector<8x128xf32>
    %c0_89 = arith.constant 0 : index
    %c0_90 = arith.constant 0 : index
    %167 = vector.load %arg18[%c0_89, %c0_90] : memref<1x128xf32, #tpu.memory_space<vmem>>, vector<1x128xf32>
    %168 = vector.broadcast %167 : vector<1x128xf32> to vector<8x128xf32>
    %169 = arith.addf %166, %168 : vector<8x128xf32>
    %cst_91 = arith.constant 5.000000e-01 : f32
    %170 = vector.broadcast %cst_91 : f32 to vector<8x128xf32>
    %171 = arith.mulf %170, %169 : vector<8x128xf32>
    %cst_92 = arith.constant 0.707106769 : f32
    %172 = vector.broadcast %cst_92 : f32 to vector<8x128xf32>
    %173 = arith.mulf %169, %172 : vector<8x128xf32>
    %cst_93 = arith.constant 0.000000e+00 : f32
    %174 = vector.broadcast %cst_93 : f32 to vector<8x128xf32>
    %175 = arith.cmpf oge, %173, %174 : vector<8x128xf32>
    %cst_94 = arith.constant 1.000000e+00 : f32
    %cst_95 = arith.constant -1.000000e+00 : f32
    %176 = vector.broadcast %cst_94 : f32 to vector<8x128xf32>
    %177 = vector.broadcast %cst_95 : f32 to vector<8x128xf32>
    %178 = arith.select %175, %176, %177 : vector<8x128xi1>, vector<8x128xf32>
    %179 = math.absf %173 : vector<8x128xf32>
    %cst_96 = arith.constant 0.327591091 : f32
    %180 = vector.broadcast %cst_96 : f32 to vector<8x128xf32>
    %181 = arith.mulf %180, %179 : vector<8x128xf32>
    %cst_97 = arith.constant 1.000000e+00 : f32
    %182 = vector.broadcast %cst_97 : f32 to vector<8x128xf32>
    %183 = arith.addf %182, %181 : vector<8x128xf32>
    %184 = tpu.reciprocal %183 {approx = true} : vector<8x128xf32> -> vector<8x128xf32>
    %cst_98 = arith.constant 1.06140542 : f32
    %185 = vector.broadcast %cst_98 : f32 to vector<8x128xf32>
    %186 = arith.mulf %185, %184 : vector<8x128xf32>
    %cst_99 = arith.constant -1.45315206 : f32
    %187 = vector.broadcast %cst_99 : f32 to vector<8x128xf32>
    %188 = arith.addf %186, %187 : vector<8x128xf32>
    %189 = arith.mulf %188, %184 : vector<8x128xf32>
    %cst_100 = arith.constant 1.42141378 : f32
    %190 = vector.broadcast %cst_100 : f32 to vector<8x128xf32>
    %191 = arith.addf %189, %190 : vector<8x128xf32>
    %192 = arith.mulf %191, %184 : vector<8x128xf32>
    %cst_101 = arith.constant -0.284496725 : f32
    %193 = vector.broadcast %cst_101 : f32 to vector<8x128xf32>
    %194 = arith.addf %192, %193 : vector<8x128xf32>
    %195 = arith.mulf %194, %184 : vector<8x128xf32>
    %cst_102 = arith.constant 0.254829586 : f32
    %196 = vector.broadcast %cst_102 : f32 to vector<8x128xf32>
    %197 = arith.addf %195, %196 : vector<8x128xf32>
    %198 = arith.mulf %197, %184 : vector<8x128xf32>
    %cst_103 = arith.constant 0.000000e+00 : f32
    %199 = vector.broadcast %cst_103 : f32 to vector<8x128xf32>
    %200 = arith.subf %199, %179 : vector<8x128xf32>
    %201 = arith.mulf %200, %179 : vector<8x128xf32>
    %202 = math.exp %201 : vector<8x128xf32>
    %203 = arith.mulf %198, %202 : vector<8x128xf32>
    %cst_104 = arith.constant 1.000000e+00 : f32
    %204 = vector.broadcast %cst_104 : f32 to vector<8x128xf32>
    %205 = arith.subf %204, %203 : vector<8x128xf32>
    %206 = arith.mulf %178, %205 : vector<8x128xf32>
    %cst_105 = arith.constant 1.000000e+00 : f32
    %207 = vector.broadcast %cst_105 : f32 to vector<8x128xf32>
    %208 = arith.addf %207, %206 : vector<8x128xf32>
    %209 = arith.mulf %171, %208 : vector<8x128xf32>
    %210 = arith.truncf %209 : vector<8x128xf32> to vector<8x128xbf16>
    %c0_106 = arith.constant 0 : index
    %c0_107 = arith.constant 0 : index
    %211 = vector.load %arg19[%c0_106, %c0_107] : memref<128x32xbf16, #tpu.memory_space<vmem>>, vector<128x32xbf16>
    %cst_108 = arith.constant dense<0.000000e+00> : vector<8x32xf32>
    %212 = tpu.matmul %210, %211, %cst_108 {dimension_numbers = #tpu.dot_dimension_numbers<[1], [0], [0], [1], [0, 0, 1, 1], [], []>} : vector<8x128xbf16>, vector<128x32xbf16>, vector<8x32xf32> -> vector<8x32xf32>
    %c0_109 = arith.constant 0 : index
    %c0_110 = arith.constant 0 : index
    %213 = vector.load %arg20[%c0_109, %c0_110] : memref<1x32xf32, #tpu.memory_space<vmem>>, vector<1x32xf32>
    %214 = vector.broadcast %213 : vector<1x32xf32> to vector<8x32xf32>
    %215 = arith.addf %212, %214 : vector<8x32xf32>
    %216 = arith.addf %139, %215 : vector<8x32xf32>
    %c0_111 = arith.constant 0 : index
    %c0_112 = arith.constant 0 : index
    %c0_113 = arith.constant 0 : index
    %217 = vector.load %arg21[%c0_111, %c0_112, %c0_113] : memref<1x8x32xf32, #tpu.memory_space<vmem>>, vector<1x8x32xf32>
    %218 = vector.shape_cast %217 : vector<1x8x32xf32> to vector<8x32xf32>
    %219 = vector.shape_cast %216 : vector<8x32xf32> to vector<1x8x32xf32>
    tpu.vector_store %arg21[%c0_111, %c0_112, %c0_113], %219 {strides = array<i32>} : memref<1x8x32xf32, #tpu.memory_space<vmem>>, vector<1x8x32xf32>,
    return
  }
  func.func @transform_0(%arg0: i32, %arg1: i32) -> (i32, i32, i32) {
    %c0_i32 = arith.constant 0 : i32
    %c0_i32_0 = arith.constant 0 : i32
    return %arg0, %arg1, %c0_i32 : i32, i32, i32
  }
  func.func @transform_1(%arg0: i32, %arg1: i32) -> (i32, i32, i32) {
    %c0_i32 = arith.constant 0 : i32
    %c0_i32_0 = arith.constant 0 : i32
    %c0_i32_1 = arith.constant 0 : i32
    return %arg0, %c0_i32, %c0_i32_0 : i32, i32, i32
  }
  func.func @transform_2(%arg0: i32, %arg1: i32) -> (i32, i32, i32) {
    %c0_i32 = arith.constant 0 : i32
    %c0_i32_0 = arith.constant 0 : i32
    %c0_i32_1 = arith.constant 0 : i32
    return %arg0, %c0_i32, %c0_i32_0 : i32, i32, i32
  }
  func.func @transform_3(%arg0: i32, %arg1: i32) -> (i32, i32) {
    %c0_i32 = arith.constant 0 : i32
    %c0_i32_0 = arith.constant 0 : i32
    %c0_i32_1 = arith.constant 0 : i32
    return %c0_i32, %c0_i32_0 : i32, i32
  }
  func.func @transform_4(%arg0: i32, %arg1: i32) -> (i32, i32) {
    %c0_i32 = arith.constant 0 : i32
    %c0_i32_0 = arith.constant 0 : i32
    %c0_i32_1 = arith.constant 0 : i32
    return %c0_i32, %c0_i32_0 : i32, i32
  }
  func.func @transform_5(%arg0: i32, %arg1: i32) -> (i32, i32) {
    %c0_i32 = arith.constant 0 : i32
    %c0_i32_0 = arith.constant 0 : i32
    %c0_i32_1 = arith.constant 0 : i32
    return %c0_i32, %c0_i32_0 : i32, i32
  }
  func.func @transform_6(%arg0: i32, %arg1: i32) -> (i32, i32) {
    %c0_i32 = arith.constant 0 : i32
    %c0_i32_0 = arith.constant 0 : i32
    %c0_i32_1 = arith.constant 0 : i32
    return %c0_i32, %c0_i32_0 : i32, i32
  }
  func.func @transform_7(%arg0: i32, %arg1: i32) -> (i32, i32) {
    %c0_i32 = arith.constant 0 : i32
    %c0_i32_0 = arith.constant 0 : i32
    %c0_i32_1 = arith.constant 0 : i32
    return %c0_i32, %c0_i32_0 : i32, i32
  }
  func.func @transform_8(%arg0: i32, %arg1: i32) -> (i32, i32) {
    %c0_i32 = arith.constant 0 : i32
    %c0_i32_0 = arith.constant 0 : i32
    %c0_i32_1 = arith.constant 0 : i32
    return %c0_i32, %c0_i32_0 : i32, i32
  }
  func.func @transform_9(%arg0: i32, %arg1: i32) -> (i32, i32) {
    %c0_i32 = arith.constant 0 : i32
    %c0_i32_0 = arith.constant 0 : i32
    %c0_i32_1 = arith.constant 0 : i32
    return %c0_i32, %c0_i32_0 : i32, i32
  }
  func.func @transform_10(%arg0: i32, %arg1: i32) -> (i32, i32) {
    %c0_i32 = arith.constant 0 : i32
    %c0_i32_0 = arith.constant 0 : i32
    %c0_i32_1 = arith.constant 0 : i32
    return %c0_i32, %c0_i32_0 : i32, i32
  }
  func.func @transform_11(%arg0: i32, %arg1: i32) -> (i32, i32) {
    %c0_i32 = arith.constant 0 : i32
    %c0_i32_0 = arith.constant 0 : i32
    %c0_i32_1 = arith.constant 0 : i32
    return %c0_i32, %c0_i32_0 : i32, i32
  }
  func.func @transform_12(%arg0: i32, %arg1: i32) -> (i32, i32) {
    %c0_i32 = arith.constant 0 : i32
    %c0_i32_0 = arith.constant 0 : i32
    %c0_i32_1 = arith.constant 0 : i32
    return %c0_i32, %c0_i32_0 : i32, i32
  }
  func.func @transform_13(%arg0: i32, %arg1: i32) -> (i32, i32) {
    %c0_i32 = arith.constant 0 : i32
    %c0_i32_0 = arith.constant 0 : i32
    %c0_i32_1 = arith.constant 0 : i32
    return %c0_i32, %c0_i32_0 : i32, i32
  }
  func.func @transform_14(%arg0: i32, %arg1: i32) -> (i32, i32) {
    %c0_i32 = arith.constant 0 : i32
    %c0_i32_0 = arith.constant 0 : i32
    %c0_i32_1 = arith.constant 0 : i32
    return %c0_i32, %c0_i32_0 : i32, i32
  }
  func.func @transform_15(%arg0: i32, %arg1: i32) -> (i32, i32) {
    %c0_i32 = arith.constant 0 : i32
    %c0_i32_0 = arith.constant 0 : i32
    %c0_i32_1 = arith.constant 0 : i32
    return %c0_i32, %c0_i32_0 : i32, i32
  }
  func.func @transform_16(%arg0: i32, %arg1: i32) -> (i32, i32) {
    %c0_i32 = arith.constant 0 : i32
    %c0_i32_0 = arith.constant 0 : i32
    %c0_i32_1 = arith.constant 0 : i32
    return %c0_i32, %c0_i32_0 : i32, i32
  }
  func.func @transform_17(%arg0: i32, %arg1: i32) -> (i32, i32) {
    %c0_i32 = arith.constant 0 : i32
    %c0_i32_0 = arith.constant 0 : i32
    %c0_i32_1 = arith.constant 0 : i32
    return %c0_i32, %c0_i32_0 : i32, i32
  }
  func.func @transform_18(%arg0: i32, %arg1: i32) -> (i32, i32) {
    %c0_i32 = arith.constant 0 : i32
    %c0_i32_0 = arith.constant 0 : i32
    %c0_i32_1 = arith.constant 0 : i32
    return %c0_i32, %c0_i32_0 : i32, i32
  }
  func.func @transform_19(%arg0: i32, %arg1: i32) -> (i32, i32, i32) {
    %c0_i32 = arith.constant 0 : i32
    %c0_i32_0 = arith.constant 0 : i32
    return %arg0, %arg1, %c0_i32 : i32, i32, i32
  }
}

</mosaic_0001>

<bundles_post_ra>
// kernel: tpu_custom_call.1
= control target key start
LH: loop header
LB: loop body
LE: loop exit
PB: predicated region body
PF: predicated region fallthrough
CT: control target
= control target key end

     0   :  { %s3684_s0 = inlined_call_operand.vmem [shape: f32[2,8,32], index: 0, kind: input, shape index: {}]   ;;  %s3685_s1 = inlined_call_operand.vmem [shape: f32[2,8,32], index: 1, kind: input, shape index: {}]   ;;  %s3686_s2 = inlined_call_operand.hbm [shape: f32[2,1,32], index: 2, kind: input, shape index: {}]   ;;  %s3687_s3 = inlined_call_operand.vmem [shape: f32[1,32], index: 3, kind: input, shape index: {}]   ;;  %s3688_s4 = inlined_call_operand.hbm [shape: f32[1,32], index: 4, kind: input, shape index: {}]   ;;  %s3689_s5 = inlined_call_operand.vmem [shape: bf16[32,32], index: 5, kind: input, shape index: {}]   ;;  %s3690_s6 = inlined_call_operand.vmem [shape: bf16[32,64], index: 6, kind: input, shape index: {}]   ;;  %s3691_s7 = inlined_call_operand.vmem [shape: bf16[32,32], index: 7, kind: input, shape index: {}]   ;;  %s3692_s8 = inlined_call_operand.hbm [shape: bf16[32,32], index: 8, kind: input, shape index: {}]   ;;  %s3693_s9 = inlined_call_operand.vmem [shape: bf16[32,32], index: 9, kind: input, shape index: {}]   ;;  %s3694_s10 = inlined_call_operand.hbm [shape: bf16[32,64], index: 10, kind: input, shape index: {}]   ;;  %s3695_s11 = inlined_call_operand.hbm [shape: bf16[32,32], index: 11, kind: input, shape index: {}]   ;;  %s3696_s12 = inlined_call_operand.hbm [shape: f32[1,32], index: 12, kind: input, shape index: {}]   ;;  %s3697_s13 = inlined_call_operand.hbm [shape: f32[1,32], index: 13, kind: input, shape index: {}]   ;;  %s3698_s14 = inlined_call_operand.vmem [shape: f32[1,32], index: 14, kind: input, shape index: {}]   ;;  %s3699_s15 = inlined_call_operand.vmem [shape: bf16[32,128], index: 15, kind: input, shape index: {}]   ;;  %s3700_s16 = inlined_call_operand.vmem [shape: f32[1,128], index: 16, kind: input, shape index: {}]   ;;  %s3701_s17 = inlined_call_operand.vmem [shape: bf16[128,32], index: 17, kind: input, shape index: {}]   ;;  %s3702_s18 = inlined_call_operand.vmem [shape: f32[1,32], index: 18, kind: input, shape index: {}]   ;;  %s3703_s19 = inlined_call_operand.hbm [shape: f32[2,8,32], index: 19, kind: output, shape index: {}]  }
   0x1   :  { %3719 = sst [smem:[#allocation23_spill]] %s3684_s0 }
   0x2   :  { %3720 = sst [smem:[#allocation24_spill]] %s3685_s1 }
   0x3   :  { %3721 = sst [smem:[#allocation25_spill]] %s3686_s2 }
   0x4   :  { %3722 = sst [smem:[#allocation26_spill]] %s3687_s3 }
   0x5   :  { %3723 = sst [smem:[#allocation27_spill]] %s3688_s4 }
   0x6   :  { %3724 = sst [smem:[#allocation28_spill]] %s3689_s5 }
   0x7   :  { %3725 = sst [smem:[#allocation29_spill]] %s3692_s8 }
   0x8   :  { %3726 = sst [smem:[#allocation30_spill]] %s3694_s10 }
   0x9   :  { %3727 = sst [smem:[#allocation31_spill]] %s3698_s14 }
   0xa   :  { %3728 = sst [smem:[#allocation32_spill]] %s3699_s15 }
   0xb   :  { %3729 = sst [smem:[#allocation33_spill]] %s3700_s16 }
   0xc   :  { %3730 = sst [smem:[#allocation34_spill]] %s3701_s17 }
   0xd   :  { %3731 = sst [smem:[#allocation35_spill]] %s3702_s18 }
   0xe   :  { %3732 = sst [smem:[#allocation36_spill]] %s3703_s19 }
   0xf   :  { %24 = vsyncpa [#allocation6], 0 }
  0x10   :  { %26 = vsyncpa [#allocation6 + $0x1], 0 }
  0x11   :  { %27 = vsyncpa [#allocation9], 0 }
  0x12   :  { %28 = vsyncpa [#allocation12], 0 }
  0x13   :  { %29 = vsyncpa [#allocation15], 0 }
  0x14   :  { %30 = vsyncpa [#allocation7], 0 }
  0x15   :  { %32 = vsyncpa [#allocation7 + $0x1], 0  ;;  %s3125_s0 = smov 0   ;;  %s3127_s30 = smov 0  }
  0x16   :  { %s3129_s20 = smov 0   ;;  %s3131_s21 = smov 0  }
  0x17   :  { %s3133_s1 = smov 0   ;;  %s3135_s22 = smov 0  }
  0x18 LB: > { %s3705_s2 = sadd.s32 4294967295, %s3000_s22   ;;  %p2237_p0 = scmp.ge.s32.totalorder %s3000_s22, 1  ;;  %s3000_s22 = sphi %s3135_s22, %s38_s22   ;;  %s2996_s1 = sphi %s3133_s1, %s3769_s1   ;;  %s2992_s21 = sphi %s3131_s21, %s3768_s21   ;;  %s2988_s20 = sphi %s3129_s20, %s3767_s20   ;;  %s2984_s30 = sphi %s3127_s30, %s3766_s30   ;;  %s2980_s0 = sphi %s3125_s0, %s3765_s0  }
  0x19   : > { %p3159_p1 = scmp.eq.s32.totalorder %s3705_s2, 0  ;;  %p499_p2 = scmp.lt.s32.totalorder %s3000_s22, 3 }
  0x1a   : > { %s3002_s25 = smov [#allocation8]   ;;  %s3003_s27 = smov [#allocation11]  }
  0x1b   : > { %s3733_s23 = scalar_select %p3159_p1, 1, 0 }
  0x1c   : > { %p3164_p3 = pnand %p2237_p0, %p499_p2  ;;  %s515_s3 = sshll.u32 %s3002_s25, 4  ;;  %s516_s3 = int_to_ptr.vmem [resolvable:$true] %s515_s3 }
  0x1d   : > { %s550_s28 = sshll.u32 %s3003_s27, 4  ;;  %s3004_s29 = smov [#allocation14]   ;;  %s3177_s28 = int_to_ptr.vmem [resolvable:$true] %s550_s28 }
  0x1e   : > { %s3734_s24 = scalar_select %p3164_p3, 1, 0 }
  0x1f   : > { %p2546_p5 = pneg %p3164_p3  ;;  %s3179_s2 = sshll.u32 %s3004_s29, 4  ;;  %s578_s2 = int_to_ptr.vmem [resolvable:$true] %s3179_s2 }
  0x20   : > { %s3736_s4 = sld [smem:[#allocation27_spill]] }
  0x21   : > { %p3173_p6 = pnand %p2546_p5, %p3159_p1 }
  0x23   : > { %p3189_p8 = pneg %p3173_p6 }
  0x26   : > { %s2708_s25 = scalar_lea.hbm %s3736_s4, 16 }
  0x27   : > { %p2709_p7 = scmp.ne.s32.totalorder %s3736_s4, %s2708_s25  ;;  %p2715_p11 = scmp.lt.u32.totalorder %s2708_s25, %s3736_s4 }
  0x29   : > { %p2711_p9 = pnand %p3189_p8, %p2709_p7 }
  0x2b   : > { %p2712_p10 = pneg %p2711_p9 }
  0x2d   : > { %p2717_p12 = pnand %p2715_p11, %p2712_p10 }
  0x2f   : > { %2720 = shalt.err (!%p2717_p12)
}
  0x30   : > { %s2721_s18 = scalar_lea.vmem %s516_s3, 16  ;;  %s2728_s16 = scalar_lea.vmem %s516_s3, 32 }
  0x31   : > { %p2722_p13 = scmp.ne.s32.totalorder %s516_s3, %s2721_s18  ;;  %p2729_p5 = scmp.lt.s32.totalorder %s516_s3, %s516_s3 }
  0x32   : > { %p2730_p4 = scmp.lt.s32.totalorder %s2728_s16, %s2721_s18 }
  0x33   : > { %p2724_p0 = pnand %p2722_p13, %p3189_p8 }
  0x34   : > { %p2731_p3 = por %p2730_p4, %p2729_p5 }
  0x35   : > { %p2725_p2 = pneg %p2724_p0 }
  0x37   : > { %p2732_p1 = pnand %p2731_p3, %p2725_p2 }
  0x39   : > { %2735 = shalt.err (!%p2732_p1)
}
  0x3a   : > { %2549 = dma.hbm_to_vmem [thread:$0]  (!%p3173_p6), %s3736_s4, 16, %s516_s3, [#allocation9]  }
  0x3b   : > { %s3738_s10 = sld [smem:[#allocation30_spill]] }
  0x41   : > { %s2736_s29 = scalar_lea.hbm %s3738_s10, 256 }
  0x42   : > { %p2737_p7 = scmp.ne.s32.totalorder %s3738_s10, %s2736_s29  ;;  %p2743_p1 = scmp.lt.u32.totalorder %s2736_s29, %s3738_s10 }
  0x44   : > { %p2739_p9 = pnand %p2737_p7, %p3189_p8 }
  0x46   : > { %p2740_p4 = pneg %p2739_p9 }
  0x48   : > { %p2745_p3 = pnand %p2743_p1, %p2740_p4 }
  0x4a   : > { %2748 = shalt.err (!%p2745_p3)
}
  0x4b   : > { %s2749_s3 = scalar_lea.vmem %s3177_s28, 256  ;;  %p2757_p13 = scmp.lt.s32.totalorder %s3177_s28, %s3177_s28 }
  0x4c   : > { %p2750_p10 = scmp.ne.s32.totalorder %s3177_s28, %s2749_s3  ;;  %p2758_p0 = scmp.lt.s32.totalorder %s2749_s3, %s2749_s3 }
  0x4e   : > { %p2752_p11 = pnand %p2750_p10, %p3189_p8  ;;  %p2759_p2 = por %p2758_p0, %p2757_p13 }
  0x50   : > { %p2753_p12 = pneg %p2752_p11 }
  0x52   : > { %p2760_p5 = pnand %p2759_p2, %p2753_p12 }
  0x54   : > { %2763 = shalt.err (!%p2760_p5)
}
  0x55   : > { %s3713_s5 = smov 64   ;;  %s3715_s15 = smov 4  }
  0x56   : > { %2555 = dma.hbm_to_vmem [thread:$0]  (!%p3173_p6), %s3738_s10, 256, %s3177_s28, [#allocation12], %s3713_s5, %s3713_s5, %s3715_s15  }
  0x57   : > { %s2764_s29 = scalar_lea.hbm %s3696_s12, 16 }
  0x58   : > { %p2765_p7 = scmp.ne.s32.totalorder %s3696_s12, %s2764_s29  ;;  %p2771_p1 = scmp.lt.u32.totalorder %s2764_s29, %s3696_s12 }
  0x5a   : > { %p2767_p9 = pnand %p2765_p7, %p3189_p8 }
  0x5c   : > { %p2768_p4 = pneg %p2767_p9 }
  0x5e   : > { %p2773_p3 = pnand %p2771_p1, %p2768_p4 }
  0x60   : > { %2776 = shalt.err (!%p2773_p3)
}
  0x61   : > { %s2777_s17 = scalar_lea.vmem %s578_s2, 16  ;;  %s2784_s28 = scalar_lea.vmem %s578_s2, 32 }
  0x62   : > { %p2778_p10 = scmp.ne.s32.totalorder %s578_s2, %s2777_s17  ;;  %p2785_p13 = scmp.lt.s32.totalorder %s578_s2, %s578_s2 }
  0x63   : > { %p2786_p0 = scmp.lt.s32.totalorder %s2784_s28, %s2777_s17 }
  0x64   : > { %p2780_p11 = pnand %p2778_p10, %p3189_p8 }
  0x65   : > { %p2787_p2 = por %p2786_p0, %p2785_p13 }
  0x66   : > { %p2781_p12 = pneg %p2780_p11 }
  0x68   : > { %p2788_p5 = pnand %p2787_p2, %p2781_p12 }
  0x6a   : > { %2791 = shalt.err (!%p2788_p5)
}
  0x6b   : > { %2561 = dma.hbm_to_vmem [thread:$0]  (!%p3173_p6), %s3696_s12, 16, %s578_s2, [#allocation15]  }
  0x6c   : > { %s3007_s4 = smov [#allocation10]   ;;  %s3008_s29 = smov [#allocation13]  }
  0x6d   : > { %s534_s27 = sshll.u32 %s3007_s4, 4  ;;  %s563_s18 = sshll.u32 %s3008_s29, 4  ;;  %s535_s27 = int_to_ptr.vmem [resolvable:$true] %s534_s27  ;;  %s564_s18 = int_to_ptr.vmem [resolvable:$true] %s563_s18 }
  0x6e   : > { %s3739_s8 = sld [smem:[#allocation29_spill]] }
  0x74   : > { %s2792_s5 = scalar_lea.hbm %s3739_s8, 256 }
  0x75   : > { %p2793_p7 = scmp.ne.s32.totalorder %s3739_s8, %s2792_s5  ;;  %p2799_p1 = scmp.lt.u32.totalorder %s2792_s5, %s3739_s8 }
  0x77   : > { %p2795_p9 = pnand %p2793_p7, %p3189_p8 }
  0x79   : > { %p2796_p4 = pneg %p2795_p9 }
  0x7b   : > { %p2801_p3 = pnand %p2799_p1, %p2796_p4 }
  0x7d   : > { %2804 = shalt.err (!%p2801_p3)
}
  0x7e   : > { %s2805_s2 = scalar_lea.vmem %s535_s27, 256  ;;  %p2813_p13 = scmp.lt.s32.totalorder %s535_s27, %s535_s27 }
  0x7f   : > { %p2806_p10 = scmp.ne.s32.totalorder %s535_s27, %s2805_s2  ;;  %p2814_p0 = scmp.lt.s32.totalorder %s2805_s2, %s2805_s2 }
  0x81   : > { %p2808_p11 = pnand %p2806_p10, %p3189_p8  ;;  %p2815_p2 = por %p2814_p0, %p2813_p13 }
  0x83   : > { %p2809_p12 = pneg %p2808_p11 }
  0x85   : > { %p2816_p5 = pnand %p2815_p2, %p2809_p12 }
  0x87   : > { %2819 = shalt.err (!%p2816_p5)
}
  0x88   : > { %s3740_s25 = smov 4   ;;  %s3741_s4 = smov 64  }
  0x89   : > { %2552 = dma.hbm_to_vmem [thread:$0]  (!%p3173_p6), %s3739_s8, 256, %s535_s27, [#allocation9], %s3741_s4, %s3741_s4, %s3740_s25  }
  0x8a   : > { %s2820_s3 = scalar_lea.hbm %s3695_s11, 256 }
  0x8b   : > { %p2821_p7 = scmp.ne.s32.totalorder %s3695_s11, %s2820_s3  ;;  %p2827_p1 = scmp.lt.u32.totalorder %s2820_s3, %s3695_s11 }
  0x8d   : > { %p2823_p9 = pnand %p2821_p7, %p3189_p8 }
  0x8f   : > { %p2824_p4 = pneg %p2823_p9 }
  0x91   : > { %p2829_p3 = pnand %p2827_p1, %p2824_p4 }
  0x93   : > { %2832 = shalt.err (!%p2829_p3)
}
  0x94   : > { %s2833_s15 = scalar_lea.vmem %s564_s18, 256  ;;  %p2841_p13 = scmp.lt.s32.totalorder %s564_s18, %s564_s18 }
  0x95   : > { %p2834_p10 = scmp.ne.s32.totalorder %s564_s18, %s2833_s15  ;;  %p2842_p0 = scmp.lt.s32.totalorder %s2833_s15, %s2833_s15 }
  0x97   : > { %p2836_p11 = pnand %p2834_p10, %p3189_p8  ;;  %p2843_p2 = por %p2842_p0, %p2841_p13 }
  0x99   : > { %p2837_p12 = pneg %p2836_p11 }
  0x9b   : > { %p2844_p5 = pnand %p2843_p2, %p2837_p12 }
  0x9d   : > { %2847 = shalt.err (!%p2844_p5)
}
  0x9e   : > { %2558 = dma.hbm_to_vmem [thread:$0]  (!%p3173_p6), %s3695_s11, 256, %s564_s18, [#allocation12], %s3741_s4, %s3741_s4, %s3740_s25  }
  0x9f   : > { %s3009_s29 = smov [#allocation16]   ;;  %s2848_s28 = scalar_lea.hbm %s3697_s13, 16 }
  0xa0   : > { %s588_s16 = sshll.u32 %s3009_s29, 4  ;;  %p2849_p7 = scmp.ne.s32.totalorder %s3697_s13, %s2848_s28  ;;  %s589_s16 = int_to_ptr.vmem [resolvable:$true] %s588_s16 }
  0xa1   : > { %p2855_p1 = scmp.lt.u32.totalorder %s2848_s28, %s3697_s13 }
  0xa2   : > { %p2851_p9 = pnand %p2849_p7, %p3189_p8 }
  0xa4   : > { %p2852_p4 = pneg %p2851_p9 }
  0xa6   : > { %p2857_p3 = pnand %p2855_p1, %p2852_p4 }
  0xa8   : > { %2860 = shalt.err (!%p2857_p3)
}
  0xa9   : > { %s2861_s18 = scalar_lea.vmem %s589_s16, 16  ;;  %s2868_s25 = scalar_lea.vmem %s589_s16, 32 }
  0xaa   : > { %p2862_p10 = scmp.ne.s32.totalorder %s589_s16, %s2861_s18  ;;  %p2869_p13 = scmp.lt.s32.totalorder %s589_s16, %s589_s16 }
  0xab   : > { %p2870_p0 = scmp.lt.s32.totalorder %s2868_s25, %s2861_s18 }
  0xac   : > { %p2864_p11 = pnand %p2862_p10, %p3189_p8 }
  0xad   : > { %p2871_p2 = por %p2870_p0, %p2869_p13 }
  0xae   : > { %p2865_p12 = pneg %p2864_p11 }
  0xb0   : > { %p2872_p5 = pnand %p2871_p2, %p2865_p12 }
  0xb2   : > { %2875 = shalt.err (!%p2872_p5)
}
  0xb3   : > { %2564 = dma.hbm_to_vmem [thread:$0]  (!%p3173_p6), %s3697_s13, 16, %s589_s16, [#allocation15]  }
  0xb4   : > { %s2236_s8 = sadd.s32 4294967294, %s3000_s22   ;;  %s50_s14 = sadd.s32 1, %s2996_s1 }
  0xb5   : > { %p52_p8 = scmp.ge.s32.totalorder %s50_s14, 2  ;;  %s111_s26 = sadd.s32 1, %s2988_s20 }
  0xb6   : > { %p118_p7 = scmp.ne.s32.totalorder %s2988_s20, %s2984_s30  ;;  %p119_p9 = scmp.eq.s32.totalorder %s3000_s22, 0 }
  0xb7   : > { %s3771_s14 = smov (%p52_p8, %s50_s14), 0  ;;  %p124_p1 = scmp.ne.s32.totalorder %s2984_s30, %s2980_s0 }
  0xb8   : > { %p3318_p4 = por %p119_p9, %p118_p7  ;;  %s108_s29 = ssub.s32 %s2996_s1, %s3771_s14 }
  0xb9   : > { %s3743_s16 = sadd.s32 4294967295, %s3000_s22   ;;  %p109_p3 = scmp.eq.s32.totalorder %s108_s29, 0 }
  0xba   : > { %p486_p6 = scmp.eq.s32.totalorder %s3743_s16, 1  ;;  %p3744_p10 = scmp.ne.s32.totalorder %s3733_s23, 0 }
  0xbb   : > { %p492_p13 = scmp.eq.s32.totalorder %s2236_s8, 1  ;;  %p2579_p2 = scmp.lt.s32.totalorder %s3000_s22, 2 }
  0xbc   : > { %p3330_p11 = por %p3744_p10, %p124_p1  ;;  %p3334_p12 = por %p486_p6, %p118_p7 }
  0xbd   : > { %s3339_s28 = scalar_select %p109_p3, %s2988_s20, %s111_s26  }
  0xbe   : > { %s3746_s17 = scalar_select %p3334_p12, 1, 0 }
  0xbf   : > { %p3341_p0 = por %p492_p13, %p124_p1  ;;  %s631_s2 = sand.u32 1, %s2988_s20  }
  0xc0   : > { %s2245_s15 = sshll.u32 %s2996_s1, 4  ;;  %s3748_s4 = sld [smem:[#allocation25_spill]] }
  0xc1   : > { %s3747_s19 = scalar_select %p3341_p0, 1, 0 }
  0xc2   : > { %s634_s29 = scalar_lea.vmem [#allocation5], %s631_s2  ;;  %p3357_p5 = pnand %p2579_p2, %p3318_p4 }
  0xc3   : > { %s641_s8 = sshll.u32 %s634_s29, 4  ;;  %s632_s16 = scalar_lea.sflag [#allocation6], %s631_s2  ;;  %s3353_s8 = int_to_ptr.vmem [resolvable:$true] %s641_s8 }
  0xc4   : > { %p2878_p7 = pneg %p3357_p5 }
  0xc6   : > { %s3351_s27 = scalar_lea.hbm %s3748_s4, %s2245_s15  ;;  %s2881_s25 = scalar_lea.hbm %s3748_s4, 32 }
  0xc7   : > { %s2876_s10 = scalar_lea.hbm %s3351_s27, 16  ;;  %p2882_p4 = scmp.lt.u32.totalorder %s3351_s27, %s3748_s4 }
  0xc8   : > { %p2877_p8 = scmp.ne.s32.totalorder %s3351_s27, %s2876_s10  ;;  %p2883_p6 = scmp.lt.u32.totalorder %s2881_s25, %s2876_s10 }
  0xc9   : > { %p2885_p10 = scmp.lt.u32.totalorder %s2876_s10, %s3351_s27 }
  0xca   : > { %p2879_p9 = pnand %p2878_p7, %p2877_p8  ;;  %p2884_p3 = por %p2883_p6, %p2882_p4 }
  0xcc   : > { %p2880_p1 = pneg %p2879_p9  ;;  %p2886_p13 = por %p2885_p10, %p2884_p3 }
  0xce   : > { %p2887_p2 = pnand %p2886_p13, %p2880_p1 }
  0xd0   : > { %2890 = shalt.err (!%p2887_p2)
}
  0xd1   : > { %s2891_s2 = scalar_lea.vmem %s3353_s8, 16  ;;  %s3010_s15 = smov [#allocation5]  }
  0xd2   : > { %p2892_p8 = scmp.ne.s32.totalorder %s3353_s8, %s2891_s2  ;;  %s2896_s18 = sshll.u32 %s3010_s15, 4  ;;  %s2897_s18 = int_to_ptr.vmem [resolvable:$false] %s2896_s18 }
  0xd3   : > { %s2898_s5 = scalar_lea.vmem %s2897_s18, 32  ;;  %p2899_p12 = scmp.lt.s32.totalorder %s3353_s8, %s2897_s18 }
  0xd4   : > { %p2894_p9 = pnand %p2892_p8, %p2878_p7  ;;  %p2900_p4 = scmp.lt.s32.totalorder %s2898_s5, %s2891_s2 }
  0xd6   : > { %p2895_p0 = pneg %p2894_p9  ;;  %p2901_p6 = por %p2900_p4, %p2899_p12 }
  0xd8   : > { %p2902_p3 = pnand %p2901_p6, %p2895_p0 }
  0xda   : > { %2905 = shalt.err (!%p2902_p3)
}
  0xdb   : > { %2568 = dma.hbm_to_vmem [thread:$0]  (!%p3357_p5), %s3351_s27, 16, %s3353_s8, %s632_s16  }
  0xdc   : > { %p3750_p1 = scmp.ne.s32.totalorder %s3734_s24, 0 }
  0xdd   : > { %s3389_s10 = sand.u32 (!%p3750_p1), 1, %s2984_s30  }
  0xde   : > { %650 = sbr.rel (%p3750_p1) target bundleno = 3055 (0xbef), region = 96  ;;  %s653_s25 = scalar_lea.sflag (!%p3750_p1), [#allocation6], %s3389_s10 }
  0xdf   : > { %s655_s29 = scalar_lea.vmem (!%p3750_p1), [#allocation5], %s3389_s10 }
  0xe5   : > { %2959 = dma.done.wait (%p3330_p11), %s653_s25, 16  }
  0xe6   : > { %2961 = vsyncadd (%p3330_p11), %s653_s25, 4294967280  ;;  %p3751_p12 = scmp.ne.s32.totalorder %s3733_s23, 0 }
  0xe8   : > { %2963 = dma.done.wait (%p3751_p12), [#allocation9], 272  }
  0xe9   : > { %2965 = vsyncadd (%p3751_p12), [#allocation9], 4294967024 }
  0xea   : > { %2967 = dma.done.wait (%p3751_p12), [#allocation12], 512  }
  0xeb   : > { %2969 = vsyncadd (%p3751_p12), [#allocation12], 4294966784 }
  0xec   : > { %2971 = dma.done.wait (%p3751_p12), [#allocation15], 32  }
  0xed   : > { %2973 = vsyncadd (%p3751_p12), [#allocation15], 4294967264  ;;  %p744_p11 = scmp.lt.s32.totalorder %s2992_s21, 1  ;;  %s3752_s26 = sld [smem:[#allocation24_spill]]  ;;  %vm776_vm0 = vcmask 261120   ;;  %v2656_v14 = vld [vmem:[#allocation10] sm:$0xff]   ;;  %v841_v49 = vlaneseq }
  0xee   : > { %s3753_s18 = sld [smem:[#allocation23_spill]]  ;;  %v3011_v15 = vmov 0.0   ;;  %v2657_v16 = vld [vmem:[#allocation10 + $0x8] sm:$0xff]   ;;  %v758_v17 = vld [vmem:[%s655_s29] sm:$0x1]  ;;  %vm3012_vm1 = vmmov 0  }
  0xef   : > { %s745_s24 = scalar_select %p744_p11, %s2992_s21, 1  ;;  %2370 = vmatprep.subr.bf16.mxu0 %v3011_v15  ;;  %2402 = vmatprep.subr.bf16.mxu1 %v3011_v15  ;;  %v759_v18 = vpack.c.bf16 %v758_v17, %v758_v17  ;;  %v2658_v19 = vld [vmem:[%s3691_s7] sm:$0xff]   ;;  %v2659_v21 = vld [vmem:[%s3691_s7 + $0x8] sm:$0xff]   ;;  %v2662_v37 = vld [vmem:[#allocation11] sm:$0xff]   ;;  %v842_v50 = vshrl.u32 %v841_v49, 7  ;;  %vm1036_vm2 = vcmask 60416  }
  0xf0   : > { %2371 = vmatpush3.bf16.msra.mxu0 %v2656_v14  ;;  %2374 = vmatprep.mubr.msk.bf16.mxu0 %vm3012_vm1, %v3011_v15  ;;  %v2660_v20 = vld [vmem:[%s3691_s7] sm:$0xff]   ;;  %v2661_v22 = vld [vmem:[%s3691_s7 + $0x8] sm:$0xff]   ;;  %s3754_s15 = sld [smem:[#allocation26_spill]]  ;;  %s3015_s23 = smov 104   ;;  %vm1289_vm3 = vcmask 64512   ;;  %vm1351_vm4 = vcmask 1043456  }
  0xf1   : > { %s2254_s3 = sshll.u32 %s745_s24, 3  ;;  %2372 = vmatprep.subr.bf16.mxu0 %v3011_v15  ;;  %2406 = vmatprep.mubr.msk.bf16.mxu1 %vm3012_vm1, %v3011_v15  ;;  %v2317_v32 = vld [vmem:[#allocation8] ss:$0 sm:$0xff]  ;;  %v2665_v48 = vld [vmem:[%s3693_s9 + $0x8] sm:$0xff]   ;;  %v843_v52 = vsub.s32 0, %v842_v50  ;;  %s3016_s25 = smov 96  }
  0xf2   : > { %2403 = vmatpush3.bf16.msra.mxu1 %v2660_v20  ;;  %v2663_v46 = vld [vmem:[#allocation11 + $0x8] sm:$0xff]   ;;  %s3017_s29 = smov 80   ;;  %s3018_s24 = smov 72   ;;  %vm1516_vm5 = vcmask 126016   ;;  %vm1635_vm6 = vcmask 191616   ;;  %vm1754_vm7 = vcmask 257216  }
  0xf3   : > { %s754_s16 = scalar_lea.vmem %s3752_s26, %s2254_s3  ;;  %2404 = vmatprep.subr.bf16.mxu1 %v3011_v15  ;;  %v2664_v47 = vld [vmem:[%s3693_s9] sm:$0xff]   ;;  %s3020_s27 = smov 8  }
  0xf4   : > { %s750_s5 = scalar_lea.vmem %s3753_s18, %s2254_s3  ;;  %v825_v0 = vld [vmem:[%s754_s16] sm:$0xff]  ;;  %2373 = vmatpush3.bf16.msra.mxu0 %v2657_v16  ;;  %s3755_s16 = sld [smem:[#allocation28_spill]] }
  0xf5   : > { %v3417_v1 = vld [vmem:[%s750_s5] sm:$0xff]  ;;  %v826_v2 = vsel %vm776_vm0, %v825_v0, 0.0  ;;  %2378 = vmatprep.subr.bf16.mxu0 %v3011_v15  ;;  %s3013_s18 = smov 112   ;;  %s3014_s5 = smov 120  }
  0xf6   : > { %v1076_v3 = vsel %vm776_vm0, %v3417_v1, 0.0  ;;  %827 = vadd.xlane.f32.xlu0 %v826_v2  ;;  %2405 = vmatpush3.bf16.msra.mxu1 %v2661_v22  ;;  %v2316_v30 = vld [vmem:[%s3754_s15] ss:$0 sm:$0xff]  ;;  %v2667_v2 = vld [vmem:[%s3690_s6 + $0x8] sm:$0xff]   ;;  %s3019_s3 = smov 88   ;;  %s3021_s8 = smov 16  }
  0xf7   : > { %2375 = vmatmul.mubr.msk.bf16.vlgmr.msra.gmra.mrb[0].mxu0 %vm776_vm0, %v759_v18  ;;  %2410 = vmatprep.subr.bf16.mxu1 %v3011_v15  ;;  %v2666_v58 = vld [vmem:[%s3690_s6] sm:$0xff]   ;;  %s3022_s26 = smov 24   ;;  %s2309_s2 = sshll.u32 %s2992_s21, 7 }
  0xf8   : > { %2382 = vmatprep.mubr.msk.bf16.mxu0 %vm3012_vm1, %v3011_v15  ;;  %2379 = vmatpush3.bf16.msra.mxu0 %v2658_v19  ;;  %s2061_s21 = scalar_lea.sflag [#allocation7], %s3389_s10  ;;  %p3762_p5 = scmp.ne.s32.totalorder %s3746_s17, 0 }
  0xf9   : > { %2380 = vmatprep.subr.bf16.mxu0 %v3011_v15 }
  0xfa   : > { %1077 = vadd.xlane.f32.xlu0 %v1076_v3  ;;  %v2668_v3 = vld [vmem:[%s3755_s16] sm:$0xff]  }
  0xfc   : > { %2381 = vmatpush3.bf16.msra.mxu0 %v2659_v21 }
  0xfd   : > { %2386 = vmatprep.subr.bf16.mxu0 %v3011_v15 }
 0x183   : > { %v828_v4 = vpop.xlane.xlu0 %827 }
 0x184   : > { %v830_v5 = vmul.f32 0.03125, %v828_v4 }
 0x186   : > { %v831_v6 = vsub.f32 %v825_v0, %v830_v5 }
 0x187   : > { %v1078_v7 = vpop.xlane.xlu0 %1077 }
 0x188   : > { %v1080_v8 = vmul.f32 0.03125, %v1078_v7  ;;  %v832_v9 = vmul.f32 %v831_v6, %v831_v6 }
 0x18a   : > { %v1081_v10 = vsub.f32 %v3417_v1, %v1080_v8  ;;  %v833_v11 = vsel %vm776_vm0, %v832_v9, 0.0 }
 0x18b   : > { %834 = vadd.xlane.f32.xlu1 %v833_v11 }
 0x18c   : > { %v1082_v12 = vmul.f32 %v1081_v10, %v1081_v10 }
 0x18e   : > { %v1083_v13 = vsel %vm776_vm0, %v1082_v12, 0.0 }
 0x18f   : > { %1084 = vadd.xlane.f32.xlu1 %v1083_v13 }
 0x1ca   : > { %v814_v42 = vpop.f32.mrb[0].mxu0 }
 0x1cb   : > { %v2376_v43 = vpop.f32.mrb[1].mxu0  ;;  %v820_v51 = vmul.f32 0.03125, %v814_v42 }
 0x1cc   : > { %v817_v44 = vpop.f32.mrb[2].mxu0 }
 0x1cd   : > { %v2377_v45 = vpop.f32.mrb[3].mxu0  ;;  %v917_v53 = vrot.slane %v820_v51, %v843_v52 }
 0x218   : > { %v835_v23 = vpop.xlane.xlu1 %834 }
 0x219   : > { %v836_v24 = vmul.f32 0.03125, %v835_v23 }
 0x21b   : > { %v837_v25 = vadd.f32 1e-05, %v836_v24 }
 0x21c   : > { %v1085_v26 = vpop.xlane.xlu1 %1084 }
 0x21d   : > { %2682 = vrsqrt.f32 %v837_v25  ;;  %v1086_v27 = vmul.f32 0.03125, %v1085_v26 }
 0x21f   : > { %v1087_v28 = vadd.f32 1e-05, %v1086_v27 }
 0x221   : > { %2684 = vrsqrt.f32 %v1087_v28 }
 0x227   : > { %v2683_v29 = vpop.eup %2682 }
 0x228   : > { %v839_v31 = vmul.f32 %v2683_v29, %v831_v6  ;;  %v2669_v6 = vld [vmem:[%s3755_s16 + $0x8] sm:$0xff]  }
 0x22a   : > { %v846_v33 = vmul.f32 %v2316_v30, %v839_v31 }
 0x22b   : > { %v2685_v34 = vpop.eup %2684 }
 0x22c   : > { %v853_v35 = vadd.f32 %v2317_v32, %v846_v33  ;;  %v1089_v36 = vmul.f32 %v2685_v34, %v1081_v10 }
 0x22e   : > { %v854_v38 = vpack.c.bf16 %v853_v35, %v853_v35  ;;  %v1096_v39 = vmul.f32 %v2316_v30, %v1089_v36 }
 0x230   : > { %2383 = vmatmul.mubr.msk.bf16.vlgmr.msra.gmra.mrb[4].mxu0 %vm776_vm0, %v854_v38  ;;  %v1103_v40 = vadd.f32 %v2317_v32, %v1096_v39 }
 0x231   : > { %2387 = vmatpush3.bf16.msra.mxu0 %v2662_v37  ;;  %2390 = vmatprep.mubr.msk.bf16.mxu0 %vm3012_vm1, %v3011_v15 }
 0x232   : > { %v1104_v41 = vpack.c.bf16 %v1103_v40, %v1103_v40  ;;  %2388 = vmatprep.subr.bf16.mxu0 %v3011_v15 }
 0x234   : > { %2407 = vmatmul.mubr.msk.bf16.vlgmr.msra.gmra.mrb[0].mxu1 %vm776_vm0, %v1104_v41 }
 0x235   : > { %2414 = vmatprep.mubr.msk.bf16.mxu1 %vm3012_vm1, %v3011_v15  ;;  %2389 = vmatpush3.bf16.msra.mxu0 %v2663_v46 }
 0x236   : > { %2411 = vmatpush3.bf16.msra.mxu1 %v2664_v47  ;;  %2394 = vmatprep.subr.bf16.mxu0 %v3011_v15 }
 0x237   : > { %2412 = vmatprep.subr.bf16.mxu1 %v3011_v15 }
 0x23a   : > { %2413 = vmatpush3.bf16.msra.mxu1 %v2665_v48 }
 0x23b   : > { %2418 = vmatprep.subr.bf16.mxu1 %v3011_v15 }
 0x303   : > { %v908_v54 = vpop.f32.mrb[4].mxu0 }
 0x304   : > { %v918_v55 = vmul.f32 %v917_v53, %v908_v54  ;;  %v2384_v56 = vpop.f32.mrb[5].mxu0 }
 0x305   : > { %v911_v57 = vpop.f32.mrb[6].mxu0 }
 0x306   : > { %v919_v59 = vpack.c.bf16 %v918_v55, %v918_v55  ;;  %v2385_v60 = vpop.f32.mrb[7].mxu0 }
 0x307   : > { %v1158_v61 = vpop.f32.mrb[0].mxu1 }
 0x308   : > { %v1168_v62 = vmul.f32 %v1158_v61, %v917_v53  ;;  %2391 = vmatmul.mubr.msk.bf16.vlgmr.msra.gmra.mrb[8].mxu0 %vm776_vm0, %v919_v59  ;;  %v2408_v63 = vpop.f32.mrb[1].mxu1 }
 0x309   : > { %v1161_v0 = vpop.f32.mrb[2].mxu1  ;;  %2395 = vmatpush3.bf16.msra.mxu0 %v2666_v58  ;;  %2398 = vmatprep.mubr.msk.bf16.mxu0 %vm3012_vm1, %v3011_v15 }
 0x30a   : > { %v1169_v4 = vpack.c.bf16 %v1168_v62, %v1168_v62  ;;  %v2409_v5 = vpop.f32.mrb[3].mxu1  ;;  %2396 = vmatprep.subr.bf16.mxu0 %v3011_v15 }
 0x30c   : > { %2415 = vmatmul.mubr.msk.bf16.vlgmr.msra.gmra.mrb[4].mxu1 %vm776_vm0, %v1169_v4 }
 0x30d   : > { %2397 = vmatpush3.bf16.msra.mxu0 %v2667_v2  ;;  %2419 = vmatpush3.bf16.msra.mxu1 %v2668_v3 }
 0x30e   : > { %2420 = vmatprep.subr.bf16.mxu1 %v3011_v15  ;;  %2422 = vmatprep.mubr.msk.bf16.mxu1 %vm3012_vm1, %v3011_v15 }
 0x30f   : > { %2426 = vmatprep.subr.bf16.mxu0 %v3011_v15 }
 0x311   : > { %2421 = vmatpush3.bf16.msra.mxu1 %v2669_v6 }
 0x312   : > { %2438 = vmatprep.subr.bf16.mxu1 %v3011_v15 }
 0x314   : > { %2399 = vmatmul.mubr.msk.bf16.vlgmr.msra.gmra.mrb[8].mxu0 %vm776_vm0, %v854_v38 }
 0x315   : > { %2428 = vmatprep.mubr.msk.bf16.mxu0 %vm3012_vm1, %v3011_v15 }
 0x318   : > { %2423 = vmatmul.mubr.msk.bf16.vlgmr.msra.gmra.mrb[4].mxu1 %vm776_vm0, %v1104_v41 }
 0x319   : > { %2440 = vmatprep.mubr.msk.bf16.mxu1 %vm3012_vm1, %v3011_v15 }
 0x3e7   : > { %v1029_v7 = vpop.f32.mrb[8].mxu0 }
 0x3e8   : > { %v3501_v8 = vpack.c.bf16 %v1029_v7, %v1029_v7  ;;  %v2400_v9 = vpop.f32.mrb[9].mxu0 }
 0x3e9   : > { %v1032_v10 = vpop.f32.mrb[10].mxu0 }
 0x3ea   : > { %1037 = vst.msk [vmem:[#allocation2] sm:$0xf] %vm1036_vm2, %v3501_v8  ;;  %1055 = vrot.lane.b32.xlu1 %v3501_v8, %s3013_s18  ;;  %1045 = vrot.lane.b32.xlu0 %v3501_v8, %s3014_s5  ;;  %v2401_v11 = vpop.f32.mrb[11].mxu0 }
 0x3eb   : > { %v1279_v12 = vpop.f32.mrb[4].mxu1 }
 0x3ec   : > { %v1285_v13 = vmul.f32 0.35355338, %v1279_v12  ;;  %v2424_v14 = vpop.f32.mrb[5].mxu1 }
 0x3ed   : > { %v1282_v16 = vpop.f32.mrb[6].mxu1 }
 0x3ee   : > { %v1286_v17 = vpack.c.bf16 %v1285_v13, %v1285_v13  ;;  %v2425_v18 = vpop.f32.mrb[7].mxu1  ;;  %1065 = vrot.lane.b32.xlu1 %v3501_v8, %s3015_s23 }
 0x3f0   : > { %1522 = vrot.lane.b32.xlu0 %v1286_v17, %s3013_s18  ;;  %s3756_s18 = sld [smem:[#allocation32_spill]] }
 0x3f1   : > { %v1287_v19 = vld [vmem:[#allocation2] sm:$0xf] }
 0x3f2   : > { %1403 = vrot.lane.b32.xlu1 %v1286_v17, %s3014_s5  ;;  %v1294_v20 = vsel %vm1289_vm3, %v1287_v19, 0 }
 0x3f3   : > { %2427 = vmatpush3.bf16.xpose.msra.mxu0 %v1294_v20 }
 0x3f4   : > { %2432 = vmatprep.subr.bf16.mxu0 %v3011_v15 }
 0x3f6   : > { %1641 = vrot.lane.b32.xlu1 %v1286_v17, %s3015_s23 }
 0x3fa   : > { %2429 = vmatmul.mubr.msk.bf16.vlgmr.msra.gmra.mrb[12].mxu0 %vm1289_vm3, %v1286_v17 }
 0x3fb   : > { %2434 = vmatprep.mubr.msk.bf16.mxu0 %vm3012_vm1, %v3011_v15 }
 0x45c   : > { %v1056_v21 = vpop.permute.xlu1 %1055  ;;  %v1046_v22 = vpop.permute.xlu0 %1045 }
 0x45d   : > { %1059 = vst.msk [vmem:[#allocation2 + $0x8] sm:$0xf] %vm1036_vm2, %v1056_v21  ;;  %1049 = vst.msk [vmem:[#allocation2 + $0x4] sm:$0xf] %vm1036_vm2, %v1046_v22 }
 0x460   : > { %v1066_v23 = vpop.permute.xlu1 %1065 }
 0x461   : > { %1069 = vst.msk [vmem:[#allocation2 + $0xc] sm:$0xf] %vm1036_vm2, %v1066_v23 }
 0x462   : > { %v1523_v30 = vpop.permute.xlu0 %1522 }
 0x464   : > { %v1399_v24 = vld [vmem:[#allocation2 + $0x4] sm:$0xf]  ;;  %v1519_v26 = vld [vmem:[#allocation2 + $0x8] sm:$0xf]  ;;  %v1404_v27 = vpop.permute.xlu1 %1403 }
 0x465   : > { %v1409_v25 = vsel %vm1289_vm3, %v1399_v24, 0  ;;  %v1528_v28 = vsel %vm1289_vm3, %v1519_v26, 0 }
 0x466   : > { %2439 = vmatpush3.bf16.xpose.msra.mxu1 %v1409_v25 }
 0x467   : > { %2450 = vmatprep.subr.bf16.mxu1 %v3011_v15 }
 0x468   : > { %v1638_v29 = vld [vmem:[#allocation2 + $0xc] sm:$0xf]  ;;  %v1642_v32 = vpop.permute.xlu1 %1641 }
 0x469   : > { %v1647_v31 = vsel %vm1289_vm3, %v1638_v29, 0 }
 0x46d   : > { %2441 = vmatmul.mubr.msk.bf16.vlgmr.msra.gmra.mrb[8].mxu1 %vm1289_vm3, %v1404_v27 }
 0x46e   : > { %2451 = vmatpush3.bf16.xpose.msra.mxu1 %v1528_v28  ;;  %2452 = vmatprep.mubr.msk.bf16.mxu1 %vm3012_vm1, %v3011_v15 }
 0x46f   : > { %2462 = vmatprep.subr.bf16.mxu1 %v3011_v15 }
 0x475   : > { %2453 = vmatmul.mubr.msk.bf16.vlgmr.msra.gmra.mrb[12].mxu1 %vm1289_vm3, %v1523_v30 }
 0x476   : > { %2463 = vmatpush3.bf16.xpose.msra.mxu1 %v1647_v31  ;;  %2464 = vmatprep.mubr.msk.bf16.mxu1 %vm3012_vm1, %v3011_v15 }
 0x477   : > { %2474 = vmatprep.subr.bf16.mxu1 %v3011_v15 }
 0x47d   : > { %2465 = vmatmul.mubr.msk.bf16.vlgmr.msra.gmra.mrb[16].mxu1 %vm1289_vm3, %v1642_v32 }
 0x47e   : > { %2478 = vmatprep.mubr.msk.bf16.mxu1 %vm3012_vm1, %v3011_v15 }
 0x4cd   : > { %v1330_v33 = vpop.f32.mrb[12].mxu0 }
 0x4ce   : > { %v2430_v34 = vpop.f32.mrb[13].mxu0  ;;  %v1336_v35 = vsel %vm1289_vm3, %v1330_v33, -inf }
 0x4cf   : > { %1337 = vmax.xlane.f32.xlu0 %v1336_v35  ;;  %v1333_v36 = vpop.f32.mrb[14].mxu0 }
 0x4d0   : > { %v2431_v37 = vpop.f32.mrb[15].mxu0 }
 0x540   : > { %v1445_v38 = vpop.f32.mrb[8].mxu1 }
 0x541   : > { %v2442_v39 = vpop.f32.mrb[9].mxu1  ;;  %v1451_v40 = vsel %vm1289_vm3, %v1445_v38, -inf }
 0x542   : > { %1452 = vmax.xlane.f32.xlu1 %v1451_v40  ;;  %v1448_v41 = vpop.f32.mrb[10].mxu1 }
 0x543   : > { %v2443_v42 = vpop.f32.mrb[11].mxu1 }
 0x548   : > { %v1564_v43 = vpop.f32.mrb[12].mxu1 }
 0x549   : > { %v2454_v44 = vpop.f32.mrb[13].mxu1  ;;  %v1570_v45 = vsel %vm1289_vm3, %v1564_v43, -inf }
 0x54a   : > { %v1567_v46 = vpop.f32.mrb[14].mxu1  ;;  %1571 = vmax.xlane.f32.xlu0 %v1570_v45 }
 0x54b   : > { %v2455_v47 = vpop.f32.mrb[15].mxu1 }
 0x550   : > { %v1683_v48 = vpop.f32.mrb[16].mxu1 }
 0x551   : > { %v2466_v49 = vpop.f32.mrb[17].mxu1  ;;  %v1689_v50 = vsel %vm1289_vm3, %v1683_v48, -inf }
 0x552   : > { %v1686_v51 = vpop.f32.mrb[18].mxu1  ;;  %1690 = vmax.xlane.f32.xlu0 %v1689_v50  ;;  %v2670_v49 = vld [vmem:[#allocation13] sm:$0xff]  }
 0x553   : > { %1041 = vrot.lane.b32.xlu1 %v3501_v8, %s3016_s25  ;;  %v2467_v52 = vpop.f32.mrb[19].mxu1  ;;  %2475 = vmatpush3.bf16.msra.mxu1 %v2670_v49  ;;  %v2671_v51 = vld [vmem:[#allocation13 + $0x8] sm:$0xff]  }
 0x554   : > { %2476 = vmatprep.subr.bf16.mxu1 %v3011_v15 }
 0x557   : > { %2477 = vmatpush3.bf16.msra.mxu1 %v2671_v51 }
 0x558   : > { %2490 = vmatprep.subr.bf16.mxu1 %v3011_v15 }
 0x55c   : > { %v1338_v53 = vpop.xlane.xlu0 %1337 }
 0x55d   : > { %v1339_v54 = vsub.f32 %v1330_v33, %v1338_v53 }
 0x55f   : > { %v1340_v55 = vmul.f32 1.442695, %v1339_v54 }
 0x561   : > { %2686 = vpow2.f32 %v1340_v55 }
 0x56b   : > { %v2687_v56 = vpop.eup %2686 }
 0x56c   : > { %v1342_v57 = vsel %vm1289_vm3, %v2687_v56, 0.0 }
 0x56d   : > { %1343 = vadd.xlane.f32.xlu0 %v1342_v57 }
 0x5cf   : > { %v1453_v58 = vpop.xlane.xlu1 %1452 }
 0x5d0   : > { %v1454_v59 = vsub.f32 %v1445_v38, %v1453_v58 }
 0x5d2   : > { %v1455_v60 = vmul.f32 1.442695, %v1454_v59 }
 0x5d3   : > { %v1042_v61 = vpop.permute.xlu1 %1041 }
 0x5d4   : > { %2688 = vpow2.f32 %v1455_v60  ;;  %1044 = vst.msk [vmem:[#allocation3] sm:$0xf] %vm1036_vm2, %v1042_v61 }
 0x5d7   : > { %v1572_v62 = vpop.xlane.xlu0 %1571 }
 0x5d8   : > { %v1573_v63 = vsub.f32 %v1564_v43, %v1572_v62 }
 0x5da   : > { %v1574_v0 = vmul.f32 1.442695, %v1573_v63 }
 0x5db   : > { %v1288_v2 = vld [vmem:[#allocation3] sm:$0xf] }
 0x5dc   : > { %2690 = vpow2.f32 %v1574_v0  ;;  %v1353_v3 = vsel %vm1351_vm4, %v1288_v2, 0  ;;  %v2289_v2 = vld [vmem:[#allocation14] ss:$0 sm:$0xff] }
 0x5dd   : > { %2433 = vmatpush3.bf16.msra.mxu0 %v1353_v3 }
 0x5de   : > { %v2689_v4 = vpop.eup %2688  ;;  %2444 = vmatprep.subr.bf16.mxu0 %v3011_v15 }
 0x5df   : > { %v1691_v5 = vpop.xlane.xlu0 %1690  ;;  %v1457_v6 = vsel %vm1289_vm3, %v2689_v4, 0.0 }
 0x5e0   : > { %v1692_v7 = vsub.f32 %v1683_v48, %v1691_v5  ;;  %1458 = vadd.xlane.f32.xlu1 %v1457_v6 }
 0x5e2   : > { %v1693_v9 = vmul.f32 1.442695, %v1692_v7 }
 0x5e4   : > { %2692 = vpow2.f32 %v1693_v9 }
 0x5e6   : > { %v2691_v10 = vpop.eup %2690 }
 0x5e7   : > { %v1576_v11 = vsel %vm1289_vm3, %v2691_v10, 0.0 }
 0x5e8   : > { %1577 = vadd.xlane.f32.xlu0 %v1576_v11 }
 0x5ee   : > { %v2693_v12 = vpop.eup %2692 }
 0x5ef   : > { %v1695_v13 = vsel %vm1289_vm3, %v2693_v12, 0.0 }
 0x5f0   : > { %1696 = vadd.xlane.f32.xlu0 %v1695_v13 }
 0x5f1   : > { %1060 = vrot.lane.b32.xlu1 %v3501_v8, %s3017_s29  ;;  %s3759_s29 = sld [smem:[#allocation33_spill]] }
 0x5f5   : > { %1070 = vrot.lane.b32.xlu1 %v3501_v8, %s3018_s24  ;;  %s3757_s24 = sld [smem:[#allocation31_spill]] }
 0x5fa   : > { %v1344_v14 = vpop.xlane.xlu0 %1343 }
 0x5fb   : > { %2694 = vrcp.f32 %v1344_v14 }
 0x605   : > { %v2695_v16 = vpop.eup %2694 }
 0x606   : > { %v1346_v17 = vmul.f32 %v2695_v16, %v2687_v56  ;;  %1050 = vrot.lane.b32.xlu0 %v3501_v8, %s3019_s3  ;;  %s3024_s3 = smov [#allocation17]  }
 0x608   : > { %v1347_v18 = vpack.c.bf16 %v1346_v17, %v1346_v17  ;;  %v2672_v17 = vld [vmem:[%s3756_s18] sm:$0xff]  }
 0x60a   : > { %2435 = vmatmul.mubr.msk.bf16.vlgmr.msra.gmra.mrb[16].mxu0 %vm1289_vm3, %v1347_v18 }
 0x60b   : > { %2446 = vmatprep.mubr.msk.bf16.mxu0 %vm3012_vm1, %v3011_v15 }
 0x66d   : > { %v1459_v19 = vpop.xlane.xlu1 %1458 }
 0x66e   : > { %2696 = vrcp.f32 %v1459_v19 }
 0x671   : > { %v1061_v20 = vpop.permute.xlu1 %1060 }
 0x672   : > { %1064 = vst.msk [vmem:[#allocation3 + $0x8] sm:$0xf] %vm1036_vm2, %v1061_v20 }
 0x675   : > { %v1071_v21 = vpop.permute.xlu1 %1070  ;;  %v1578_v22 = vpop.xlane.xlu0 %1577 }
 0x676   : > { %1074 = vst.msk [vmem:[#allocation3 + $0xc] sm:$0xf] %vm1036_vm2, %v1071_v21  ;;  %2698 = vrcp.f32 %v1578_v22  ;;  %v2293_v22 = vld [vmem:[#allocation16] ss:$0 sm:$0xff] }
 0x678   : > { %v2697_v8 = vpop.eup %2696 }
 0x679   : > { %v1461_v25 = vmul.f32 %v2697_v8, %v2689_v4  ;;  %v1521_v28 = vld [vmem:[#allocation3 + $0x8] sm:$0xf] }
 0x67a   : > { %v1586_v31 = vsel %vm1351_vm4, %v1521_v28, 0 }
 0x67b   : > { %v1462_v29 = vpack.c.bf16 %v1461_v25, %v1461_v25 }
 0x67d   : > { %v1697_v23 = vpop.xlane.xlu0 %1696  ;;  %v1640_v33 = vld [vmem:[#allocation3 + $0xc] sm:$0xf] }
 0x67e   : > { %2700 = vrcp.f32 %v1697_v23  ;;  %v1705_v36 = vsel %vm1351_vm4, %v1640_v33, 0 }
 0x680   : > { %v2699_v30 = vpop.eup %2698 }
 0x681   : > { %v1051_v24 = vpop.permute.xlu0 %1050  ;;  %v1580_v32 = vmul.f32 %v2699_v30, %v2691_v10 }
 0x682   : > { %1054 = vst.msk [vmem:[#allocation3 + $0x4] sm:$0xf] %vm1036_vm2, %v1051_v24  ;;  %v2294_v24 = vld [vmem:[%s3757_s24] ss:$0 sm:$0xff]  ;;  %s2253_s24 = sshll.u32 %s3389_s10, 3 }
 0x683   : > { %v1581_v34 = vpack.c.bf16 %v1580_v32, %v1580_v32  ;;  %s743_s15 = scalar_lea.vmem [#allocation17], %s2253_s24 }
 0x684   : > { %s2075_s5 = sshll.u32 %s743_s15, 4  ;;  %s3636_s5 = int_to_ptr.vmem [resolvable:$true] %s2075_s5 }
 0x685   : > { %s2906_s24 = scalar_lea.vmem %s3636_s5, 128 }
 0x686   : > { %p2907_p0 = scmp.ne.s32.totalorder %s3636_s5, %s2906_s24 }
 0x688   : > { %v2701_v35 = vpop.eup %2700  ;;  %p2908_p7 = pnand %p2907_p0, %p3762_p5 }
 0x689   : > { %v1401_v26 = vld [vmem:[#allocation3 + $0x4] sm:$0xf]  ;;  %v1699_v37 = vmul.f32 %v2701_v35, %v2693_v12  ;;  %v2295_v35 = vld [vmem:[%s3759_s29] ss:$0 sm:$0xff]  ;;  %s3761_s29 = sld [smem:[#allocation36_spill]] }
 0x68a   : > { %v1467_v27 = vsel %vm1351_vm4, %v1401_v26, 0  ;;  %p2909_p10 = pneg %p2908_p7 }
 0x68b   : > { %2445 = vmatpush3.bf16.msra.mxu0 %v1467_v27  ;;  %v1700_v38 = vpack.c.bf16 %v1699_v37, %v1699_v37 }
 0x68c   : > { %2456 = vmatprep.subr.bf16.mxu0 %v3011_v15 }
 0x68e   : > { %2447 = vmatmul.mubr.msk.bf16.vlgmr.msra.gmra.mrb[20].mxu0 %vm1289_vm3, %v1462_v29 }
 0x68f   : > { %2457 = vmatpush3.bf16.msra.mxu0 %v1586_v31  ;;  %2458 = vmatprep.mubr.msk.bf16.mxu0 %vm3012_vm1, %v3011_v15  ;;  %s3634_s4 = scalar_lea.hbm %s3761_s29, %s2309_s2 }
 0x690   : > { %2468 = vmatprep.subr.bf16.mxu0 %v3011_v15 }
 0x696   : > { %2459 = vmatmul.mubr.msk.bf16.vlgmr.msra.gmra.mrb[24].mxu0 %vm1289_vm3, %v1581_v34 }
 0x697   : > { %2469 = vmatpush3.bf16.msra.mxu0 %v1705_v36  ;;  %2470 = vmatprep.mubr.msk.bf16.mxu0 %vm3012_vm1, %v3011_v15 }
 0x698   : > { %2482 = vmatprep.subr.bf16.mxu0 %v3011_v15 }
 0x69e   : > { %2471 = vmatmul.mubr.msk.bf16.vlgmr.msra.gmra.mrb[28].mxu0 %vm1289_vm3, %v1700_v38 }
 0x69f   : > { %2486 = vmatprep.mubr.msk.bf16.mxu0 %vm3012_vm1, %v3011_v15  ;;  %2483 = vmatpush3.bf16.msra.mxu0 %v2672_v17 }
 0x6a0   : > { %2484 = vmatprep.subr.bf16.mxu0 %v3011_v15 }
 0x6dd   : > { %v1389_v39 = vpop.f32.mrb[16].mxu0 }
 0x6de   : > { %v1395_v40 = vpack.c.bf16 %v1389_v39, %v1389_v39  ;;  %v2436_v41 = vpop.f32.mrb[17].mxu0 }
 0x6df   : > { %v1392_v42 = vpop.f32.mrb[18].mxu0 }
 0x6e0   : > { %1397 = vst.msk [vmem:[#allocation4] sm:$0xf] %vm1036_vm2, %v1395_v40  ;;  %v2437_v43 = vpop.f32.mrb[19].mxu0 }
 0x761   : > { %v1503_v44 = vpop.f32.mrb[20].mxu0 }
 0x762   : > { %v2313_v45 = vpack.c.bf16 %v1503_v44, %v1503_v44  ;;  %v2448_v46 = vpop.f32.mrb[21].mxu0 }
 0x763   : > { %v1506_v47 = vpop.f32.mrb[22].mxu0 }
 0x764   : > { %1513 = vrot.lane.b32.xlu1 %v2313_v45, %s3020_s27  ;;  %v2449_v48 = vpop.f32.mrb[23].mxu0  ;;  %s2910_s27 = sshll.u32 %s3024_s3, 4  ;;  %s2911_s27 = int_to_ptr.vmem [resolvable:$false] %s2910_s27 }
 0x765   : > { %p2913_p13 = scmp.lt.s32.totalorder %s3636_s5, %s2911_s27 }
 0x769   : > { %v1622_v50 = vpop.f32.mrb[24].mxu0 }
 0x76a   : > { %v2314_v52 = vpack.c.bf16 %v1622_v50, %v1622_v50  ;;  %v2460_v53 = vpop.f32.mrb[25].mxu0 }
 0x76b   : > { %v1625_v54 = vpop.f32.mrb[26].mxu0 }
 0x76c   : > { %1632 = vrot.lane.b32.xlu1 %v2314_v52, %s3021_s8  ;;  %v2461_v55 = vpop.f32.mrb[27].mxu0  ;;  %s3758_s8 = sld [smem:[#allocation34_spill]] }
 0x771   : > { %v1741_v56 = vpop.f32.mrb[28].mxu0 }
 0x772   : > { %v2315_v57 = vpack.c.bf16 %v1741_v56, %v1741_v56  ;;  %v2472_v58 = vpop.f32.mrb[29].mxu0  ;;  %v2674_v27 = vld [vmem:[%s3758_s8] sm:$0xff]   ;;  %v2675_v28 = vld [vmem:[%s3758_s8 + $0x8] sm:$0xff]   ;;  %v2676_v29 = vld [vmem:[%s3758_s8 + $0x10] sm:$0xff]  }
 0x773   : > { %v1744_v59 = vpop.f32.mrb[30].mxu0  ;;  %v2677_v30 = vld [vmem:[%s3758_s8 + $0x18] sm:$0xff]   ;;  %v2678_v31 = vld [vmem:[%s3758_s8 + $0x20] sm:$0xff]   ;;  %v2679_v32 = vld [vmem:[%s3758_s8 + $0x28] sm:$0xff]  }
 0x774   : > { %1751 = vrot.lane.b32.xlu0 %v2315_v57, %s3022_s26  ;;  %v2473_v60 = vpop.f32.mrb[31].mxu0  ;;  %v2680_v33 = vld [vmem:[%s3758_s8 + $0x30] sm:$0xff]   ;;  %v2681_v34 = vld [vmem:[%s3758_s8 + $0x38] sm:$0xff]   ;;  %s3760_s26 = sld [smem:[#allocation35_spill]] }
 0x775   : > { %v3023_v60 = vmov -1.0  }
 0x7d6   : > { %v1514_v61 = vpop.permute.xlu1 %1513 }
 0x7d7   : > { %1517 = vst.msk [vmem:[#allocation4] sm:$0xf] %vm1516_vm5, %v1514_v61 }
 0x7de   : > { %v1633_v62 = vpop.permute.xlu1 %1632 }
 0x7df   : > { %1636 = vst.msk [vmem:[#allocation4] sm:$0xf] %vm1635_vm6, %v1633_v62 }
 0x7e6   : > { %v1752_v63 = vpop.permute.xlu0 %1751 }
 0x7e7   : > { %1755 = vst.msk [vmem:[#allocation4] sm:$0xf] %vm1754_vm7, %v1752_v63 }
 0x7ee   : > { %v1756_v0 = vld [vmem:[#allocation4] sm:$0xf] }
 0x7ef   : > { %2479 = vmatmul.mubr.msk.bf16.vlgmr.msra.gmra.mrb[20].mxu1 %vm776_vm0, %v1756_v0 }
 0x7f0   : > { %2506 = vmatprep.mubr.msk.bf16.mxu1 %vm3012_vm1, %v3011_v15  ;;  %2491 = vmatpush3.bf16.msra.mxu1 %v2674_v27 }
 0x7f1   : > { %2492 = vmatprep.subr.bf16.mxu1 %v3011_v15 }
 0x7f4   : > { %2493 = vmatpush3.bf16.msra.mxu1 %v2675_v28 }
 0x7f5   : > { %2494 = vmatprep.subr.bf16.mxu1 %v3011_v15 }
 0x7f8   : > { %2495 = vmatpush3.bf16.msra.mxu1 %v2676_v29 }
 0x7f9   : > { %2496 = vmatprep.subr.bf16.mxu1 %v3011_v15 }
 0x7fc   : > { %2497 = vmatpush3.bf16.msra.mxu1 %v2677_v30 }
 0x7fd   : > { %2498 = vmatprep.subr.bf16.mxu1 %v3011_v15 }
 0x800   : > { %2499 = vmatpush3.bf16.msra.mxu1 %v2678_v31 }
 0x801   : > { %2500 = vmatprep.subr.bf16.mxu1 %v3011_v15 }
 0x804   : > { %2501 = vmatpush3.bf16.msra.mxu1 %v2679_v32 }
 0x805   : > { %2502 = vmatprep.subr.bf16.mxu1 %v3011_v15 }
 0x808   : > { %2503 = vmatpush3.bf16.msra.mxu1 %v2680_v33 }
 0x809   : > { %2504 = vmatprep.subr.bf16.mxu1 %v3011_v15 }
 0x80c   : > { %2505 = vmatpush3.bf16.msra.mxu1 %v2681_v34 }
 0x8c2   : > { %v1817_v3 = vpop.f32.mrb[20].mxu1 }
 0x8c3   : > { %v1818_v4 = vadd.f32 %v2289_v2, %v1817_v3  ;;  %v2480_v5 = vpop.f32.mrb[21].mxu1 }
 0x8c4   : > { %v1820_v6 = vpop.f32.mrb[22].mxu1 }
 0x8c5   : > { %v3574_v7 = vadd.f32 %v1818_v4, %v3417_v1  ;;  %v2481_v9 = vpop.f32.mrb[23].mxu1  ;;  %v2673_v1 = vld [vmem:[%s3756_s18 + $0x8] sm:$0xff]   ;;  %v2299_v4 = vld [vmem:[%s3760_s26] ss:$0 sm:$0xff]  ;;  %s2912_s26 = scalar_lea.vmem %s2911_s27, 256 }
 0x8c6   : > { %2485 = vmatpush3.bf16.msra.mxu0 %v2673_v1  ;;  %p2914_p2 = scmp.lt.s32.totalorder %s2912_s26, %s2906_s24 }
 0x8c7   : > { %v1826_v10 = vsel %vm776_vm0, %v3574_v7, 0.0 }
 0x8c8   : > { %1827 = vadd.xlane.f32.xlu1 %v1826_v10  ;;  %p2915_p8 = por %p2914_p2, %p2913_p13 }
 0x8ca   : > { %p2916_p9 = pnand %p2915_p8, %p2909_p10 }
 0x955   : > { %v1828_v11 = vpop.xlane.xlu1 %1827 }
 0x956   : > { %v1829_v12 = vmul.f32 0.03125, %v1828_v11 }
 0x958   : > { %v1830_v13 = vsub.f32 %v3574_v7, %v1829_v12 }
 0x95a   : > { %v1831_v14 = vmul.f32 %v1830_v13, %v1830_v13 }
 0x95c   : > { %v1832_v16 = vsel %vm776_vm0, %v1831_v14, 0.0 }
 0x95d   : > { %1833 = vadd.xlane.f32.xlu0 %v1832_v16 }
 0x9ea   : > { %v1834_v18 = vpop.xlane.xlu0 %1833 }
 0x9eb   : > { %v1835_v19 = vmul.f32 0.03125, %v1834_v18 }
 0x9ed   : > { %v1836_v20 = vadd.f32 1e-05, %v1835_v19 }
 0x9ef   : > { %2702 = vrsqrt.f32 %v1836_v20 }
 0x9f9   : > { %v2703_v21 = vpop.eup %2702 }
 0x9fa   : > { %v1838_v23 = vmul.f32 %v2703_v21, %v1830_v13 }
 0x9fc   : > { %v1845_v8 = vmul.f32 %v2293_v22, %v1838_v23 }
 0x9fe   : > { %v1852_v25 = vadd.f32 %v2294_v24, %v1845_v8 }
 0xa00   : > { %v1853_v26 = vpack.c.bf16 %v1852_v25, %v1852_v25 }
 0xa02   : > { %2487 = vmatmul.mubr.msk.bf16.vlgmr.msra.gmra.mrb[32].mxu0 %vm776_vm0, %v1853_v26 }
 0xad5   : > { %v1914_v36 = vpop.f32.mrb[32].mxu0 }
 0xad6   : > { %v1915_v37 = vadd.f32 %v2295_v35, %v1914_v36  ;;  %v2488_v38 = vpop.f32.mrb[33].mxu0 }
 0xad7   : > { %v1917_v39 = vpop.f32.mrb[34].mxu0 }
 0xad8   : > { %v1921_v40 = vmul.f32 0.70710677, %v1915_v37  ;;  %v2489_v41 = vpop.f32.mrb[35].mxu0  ;;  %v1920_v63 = vmul.f32 0.5, %v1915_v37 }
 0xada   : > { %v1924_v42 = vand.u32 2147483647, %v1921_v40  ;;  %vm1922_vm8 = vcmp.ge.f32.partialorder %v1921_v40, 0.0 }
 0xadb   : > { %v1923_v61 = vsel %vm1922_vm8, 1.0, %v3023_v60 }
 0xadc   : > { %v1925_v43 = vmul.f32 0.3275911, %v1924_v42  ;;  %v1937_v15 = vsub.f32 0.0, %v1924_v42 }
 0xade   : > { %v1926_v44 = vadd.f32 1.0, %v1925_v43  ;;  %v1938_v46 = vmul.f32 %v1937_v15, %v1924_v42 }
 0xae0   : > { %2704 = vrcp.f32 %v1926_v44  ;;  %v1939_v49 = vmul.f32 1.442695, %v1938_v46 }
 0xae2   : > { %2706 = vpow2.f32 %v1939_v49 }
 0xaea   : > { %v2705_v45 = vpop.eup %2704 }
 0xaeb   : > { %v1928_v47 = vmul.f32 1.0614054, %v2705_v45 }
 0xaec   : > { %v2707_v57 = vpop.eup %2706 }
 0xaed   : > { %v1929_v48 = vadd.f32 -1.4531521, %v1928_v47 }
 0xaef   : > { %v1930_v50 = vmul.f32 %v2705_v45, %v1929_v48 }
 0xaf1   : > { %v1931_v51 = vadd.f32 1.4214138, %v1930_v50 }
 0xaf3   : > { %v1932_v52 = vmul.f32 %v2705_v45, %v1931_v51 }
 0xaf5   : > { %v1933_v53 = vadd.f32 -0.28449672, %v1932_v52 }
 0xaf7   : > { %v1934_v54 = vmul.f32 %v2705_v45, %v1933_v53 }
 0xaf9   : > { %v1935_v55 = vadd.f32 0.2548296, %v1934_v54 }
 0xafb   : > { %v1936_v56 = vmul.f32 %v2705_v45, %v1935_v55 }
 0xafd   : > { %v1941_v58 = vmul.f32 %v2707_v57, %v1936_v56 }
 0xaff   : > { %v1942_v59 = vsub.f32 1.0, %v1941_v58 }
 0xb01   : > { %v1943_v62 = vmul.f32 %v1942_v59, %v1923_v61 }
 0xb03   : > { %v1944_v0 = vadd.f32 1.0, %v1943_v62 }
 0xb05   : > { %v1945_v2 = vmul.f32 %v1944_v0, %v1920_v63 }
 0xb07   : > { %v1946_v3 = vpack.c.bf16 %v1945_v2, %v1945_v2 }
 0xb09   : > { %2507 = vmatmul.mubr.bf16.vlgmr.msra.gmra.mrb[24].mxu1 %v1946_v3 }
 0xbdc   : > { %v2052_v5 = vpop.f32.mrb[24].mxu1 }
 0xbdd   : > { %v2053_v6 = vadd.f32 %v2299_v4, %v2052_v5  ;;  %v2508_v9 = vpop.f32.mrb[25].mxu1 }
 0xbde   : > { %v2055_v10 = vpop.f32.mrb[26].mxu1 }
 0xbdf   : > { %v2058_v11 = vadd.f32 %v2053_v6, %v3574_v7  ;;  %v2509_v12 = vpop.f32.mrb[27].mxu1 }
 0xbe1   : > { %2059 = vst.msk [vmem:[%s743_s15] sm:$0xff] %vm776_vm0, %v2058_v11 }
 0xbe2   : > { %2919 = shalt.err (!%p2916_p9)
}
 0xbe3   : > { %s2920_s10 = scalar_lea.hbm %s3634_s4, 128  ;;  %s2924_s23 = scalar_lea.hbm %s3761_s29, 256 }
 0xbe4   : > { %p2921_p4 = scmp.ne.s32.totalorder %s3634_s4, %s2920_s10  ;;  %p2925_p1 = scmp.lt.u32.totalorder %s3634_s4, %s3761_s29 }
 0xbe5   : > { %p2926_p12 = scmp.lt.u32.totalorder %s2924_s23, %s2920_s10  ;;  %p2928_p0 = scmp.lt.u32.totalorder %s2920_s10, %s3634_s4 }
 0xbe6   : > { %p2922_p6 = pnand %p2921_p4, %p3762_p5 }
 0xbe7   : > { %p2927_p11 = por %p2926_p12, %p2925_p1 }
 0xbe8   : > { %p2923_p3 = pneg %p2922_p6 }
 0xbe9   : > { %p2929_p7 = por %p2928_p0, %p2927_p11 }
 0xbeb   : > { %p2930_p10 = pnand %p2929_p7, %p2923_p3 }
 0xbed   : > { %2933 = shalt.err (!%p2930_p10)
}
 0xbee   : > { %2544 = dma.vmem_to_hbm [thread:$0]  (%p3762_p5), %s3636_s5, 128, %s3634_s4, %s2061_s21  }
 0xbef PF: > { %s2087_s24 = sand.u32 1, %s2980_s0   ;;  %p3763_p13 = scmp.ne.s32.totalorder %s3747_s19, 0 }
 0xbf0   : > { %p3764_p2 = scmp.ge.s32.totalorder %s3000_s22, 2  ;;  %s2088_s27 = scalar_lea.sflag [#allocation7], %s2087_s24 }
 0xbf2   : > { %p2570_p8 = pnand %p3764_p2, %p3763_p13 }
 0xbf4   : > { %2975 = dma.done.wait (!%p2570_p8), %s2088_s27, 128  }
 0xbf5   : > { %2977 = vsyncadd (!%p2570_p8), %s2088_s27, 4294967168  ;;  %s38_s22 = sadd.s32 1, %s3000_s22   ;;  %s3765_s0 = smov %s2984_s30 }
 0xbf6   : > { %p35_p9 = scmp.ge.s32.totalorder %s38_s22, 4   ;;  %s3766_s30 = smov %s2988_s20 }
 0xbf7   : > { %s3767_s20 = smov %s3339_s28  ;;  %s3768_s21 = smov %s2996_s1 }
 0xbf8   : > { %s3769_s1 = smov %s3771_s14  ;;  %37 = sbr.rel (!%p35_p9) target bundleno = 24 (0x18), region = 187 }
 0xbff   :  { %2093 = vsyncpa [#allocation6], 1 }
 0xc00   :  { %2095 = vsyncpa [#allocation6 + $0x1], 1 }
 0xc01   :  { %2096 = vsyncpa [#allocation9], 1 }
 0xc02   :  { %2097 = vsyncpa [#allocation12], 1 }
 0xc03   :  { %2098 = vsyncpa [#allocation15], 1 }
 0xc04   :  { %2099 = vsyncpa [#allocation7], 1 }
 0xc05   :  { %2101 = vsyncpa [#allocation7 + $0x1], 1 }

</bundles_post_ra>
